<compile_context>
chip_gen: v6e
topology: v6e:2x2x1
jax: 0.10.0
libtpu: 0.0.40
codegen_flags: <defaults>
</compile_context>

<pallas_src>
import numpy as np
import jax
import jax.numpy as jnp
from jax.experimental import pallas as pl
from jax.experimental.pallas import tpu as pltpu


# ----------------------------------------------------------------------------
# Fused kernel: Encoder -> reparameterize -> Decoder ('1d' path)
# ----------------------------------------------------------------------------
def _vae_fused_kernel(
    x_ref, eps_ref,
    wc1, bc1, wc2, bc2, wc3, bc3, wc4, bc4, wml, bml,
    wf1, bf1, wd1, bd1, wd2, bd2, wd3, bd3, wd4, bd4,
    recon_ref, mu_ref, ls_ref,
):
    f32 = jnp.float32
    bf16 = jnp.bfloat16

    def mm(a, w_ref):
        # bf16 MXU operands, f32 accumulation.
        return jnp.dot(a.astype(bf16), w_ref[...], preferred_element_type=f32)

    def layer(a, w_ref, b_ref, relu=True):
        y = mm(a, w_ref) + b_ref[...]
        return jnp.maximum(y, 0.0) if relu else y

    # ---------------- Encoder ----------------
    h = x_ref[...]                        # (bt, C_img*4) f32, NCW-flat rows
    h = layer(h, wc1, bc1)                # conv1 (folded)  -> (bt, 3*32)
    h = layer(h, wc2, bc2)                # conv2 (folded)  -> (bt, 2*64)
    h = layer(h, wc3, bc3)                # conv3 (folded)  -> (bt, 128)
    h = layer(h, wc4, bc4)                # conv4 (k=1)     -> (bt, 256)
    ml = layer(h, wml, bml, relu=False)   # fused mu|logsigma -> (bt, 2*latent)

    latent = ml.shape[-1] // 2
    mu = ml[:, :latent]
    logsigma = ml[:, latent:]
    mu_ref[...] = mu
    ls_ref[...] = logsigma

    # --------- Reparameterize: z = eps * exp(logsigma) + mu ---------
    z = eps_ref[...] * jnp.exp(logsigma) + mu        # (bt, latent) f32

    # ---------------- Decoder ----------------
    h = layer(z, wf1, bf1)                # fc1            -> (bt, 1024)
    h = layer(h, wd1, bd1)                # deconv1 (folded)-> (bt, 2*128)
    h = layer(h, wd2, bd2)                # deconv2 (folded)-> (bt, 3*64)
    h = layer(h, wd3, bd3)                # deconv3 (folded)-> (bt, 4*32)
    recon_ref[...] = layer(h, wd4, bd4, relu=False)   # (bt, C_img*4), NCW-flat


# ----------------------------------------------------------------------------
# One-time weight folding / dtype prep (host side, outside jit)
# ----------------------------------------------------------------------------
def _fold_conv1d(w, l_in, channel_major_input=False):
    """Conv1d weight (C_out, C_in, K) -> (C_in*L_in, L_out*C_out) folded matrix.
    Input rows are position-major [l*C_in + i] unless channel_major_input
    (NCW-flat [i*L_in + l]); output columns are position-major [l*C_out + o]."""
    w = np.asarray(w, np.float32)
    c_out, c_in, k_sz = w.shape
    l_out = l_in - k_sz + 1
    big = np.zeros((c_in * l_in, l_out * c_out), np.float32)
    for l in range(l_out):
        for k in range(k_sz):
            src = l + k
            blk = w[:, :, k].T                                    # (c_in, c_out)
            if channel_major_input:
                big[src::l_in, l * c_out:(l + 1) * c_out] = blk
            else:
                big[src * c_in:(src + 1) * c_in, l * c_out:(l + 1) * c_out] = blk
    return big


def _fold_deconv1d(w, l_in):
    """ConvTranspose1d weight (C_in, C_out, K) -> (C_in*L_in, L_out*C_out);
    position-major input/output layouts."""
    w = np.asarray(w, np.float32)
    c_in, c_out, k_sz = w.shape
    l_out = l_in + k_sz - 1
    big = np.zeros((c_in * l_in, l_out * c_out), np.float32)
    for l in range(l_in):
        for k in range(k_sz):
            m = l + k
            big[l * c_in:(l + 1) * c_in, m * c_out:(m + 1) * c_out] = w[:, :, k]
    return big


def _fold_deconv1d_k1_to_ncw(w, l_in):
    """ConvTranspose1d k=1 weight (C_in, C_out, 1) -> (C_in*L_in, C_out*L_in)
    with output columns in NCW-flat order [c*L_in + l]."""
    w = np.asarray(w, np.float32)
    c_in, c_out, _ = w.shape
    big = np.zeros((c_in * l_in, c_out * l_in), np.float32)
    for l in range(l_in):
        big[l * c_in:(l + 1) * c_in, l::l_in] = w[:, :, 0]
    return big


def prepare_params(raw, seq_len=4):
    bf = jnp.bfloat16
    f32 = jnp.float32
    npf = lambda a: np.asarray(a, np.float32)
    W = lambda a: jnp.asarray(a, bf)
    B_ = lambda a: jnp.asarray(np.asarray(a, np.float32).reshape(1, -1), f32)

    return dict(
        # Encoder: NCW-flat input for conv1; position-major thereafter.
        wc1=W(_fold_conv1d(raw["conv1_w"], seq_len, channel_major_input=True)),
        bc1=B_(np.tile(npf(raw["conv1_b"]), seq_len - 1)),
        wc2=W(_fold_conv1d(raw["conv2_w"], seq_len - 1)),
        bc2=B_(np.tile(npf(raw["conv2_b"]), seq_len - 2)),
        wc3=W(_fold_conv1d(raw["conv3_w"], seq_len - 2)),
        bc3=B_(np.tile(npf(raw["conv3_b"]), seq_len - 3)),
        wc4=W(_fold_conv1d(raw["conv4_w"], 1)),
        bc4=B_(raw["conv4_b"]),
        # Fused mu | logsigma head.
        wml=W(np.concatenate([npf(raw["fc_mu_w"]).T, npf(raw["fc_ls_w"]).T], axis=1)),
        bml=B_(np.concatenate([npf(raw["fc_mu_b"]), npf(raw["fc_ls_b"])])),
        # Decoder.
        wf1=W(npf(raw["fc1_w"]).T),
        bf1=B_(raw["fc1_b"]),
        wd1=W(_fold_deconv1d(raw["dec1_w"], 1)),
        bd1=B_(np.tile(npf(raw["dec1_b"]), 2)),
        wd2=W(_fold_deconv1d(raw["dec2_w"], 2)),
        bd2=B_(np.tile(npf(raw["dec2_b"]), 3)),
        wd3=W(_fold_deconv1d(raw["dec3_w"], 3)),
        bd3=B_(np.tile(npf(raw["dec3_b"]), 4)),
        wd4=W(_fold_deconv1d_k1_to_ncw(raw["dec4_w"], 4)),
        bd4=B_(np.repeat(npf(raw["dec4_b"]), 4)),
    )


_PARAM_ORDER = ("wc1", "bc1", "wc2", "bc2", "wc3", "bc3", "wc4", "bc4",
                "wml", "bml", "wf1", "bf1",
                "wd1", "bd1", "wd2", "bd2", "wd3", "bd3", "wd4", "bd4")


# ----------------------------------------------------------------------------
# Full VAE forward (MODEL.forward, dimension='1d')
# ----------------------------------------------------------------------------
def vae_forward(params, x_ncw, eps):
    """x_ncw: (B, C_img, 4) PyTorch NCW layout. eps: (B, latent).
    Returns (recon (B, C_img, 4), mu (B, latent), logsigma (B, latent))."""
    B, c_img, L = x_ncw.shape
    latent = eps.shape[-1]
    assert L == 4, "encoder conv stack (k=2,2,2,1) requires input length 4"

    # Row-major reshapes only (bitcasts) -- no transposes outside the kernel.
    x_flat = x_ncw.reshape(B, c_img * L).astype(jnp.float32)
    eps_f = eps.astype(jnp.float32)

    # Batch tile: whole batch for small B; shard across cores for large B.
    if B > 8 and B % 8 == 0:
        bt = 8
        while bt * 2 <= min(B, 128) and B % (bt * 2) == 0:
            bt *= 2
    else:
        bt = B
    grid = (B // bt,)

    row_spec = lambda n: pl.BlockSpec((bt, n), lambda i: (i, 0))
    full_spec = lambda a: pl.BlockSpec(a.shape, lambda i: (0, 0))

    weights = tuple(params[k] for k in _PARAM_ORDER)
    args = (x_flat, eps_f) + weights
    in_specs = [row_spec(c_img * L), row_spec(latent)] + [full_spec(a) for a in weights]

    flops = 2 * B * sum(int(params[k].shape[0]) * int(params[k].shape[1])
                        for k in _PARAM_ORDER[0::2])
    bytes_accessed = int(sum(int(a.size) * a.dtype.itemsize for a in args)
                         + 4 * (B * c_img * L + 2 * B * latent))

    recon_flat, mu, logsigma = pl.pallas_call(
        _vae_fused_kernel,
        grid=grid,
        in_specs=in_specs,
        out_specs=(row_spec(c_img * L), row_spec(latent), row_spec(latent)),
        out_shape=(
            jax.ShapeDtypeStruct((B, c_img * L), jnp.float32),
            jax.ShapeDtypeStruct((B, latent), jnp.float32),
            jax.ShapeDtypeStruct((B, latent), jnp.float32),
        ),
        compiler_params=pltpu.CompilerParams(dimension_semantics=("parallel",)),
        cost_estimate=pl.CostEstimate(flops=flops, transcendentals=B * latent,
                                      bytes_accessed=bytes_accessed),
    )(*args)

    return recon_flat.reshape(B, c_img, L), mu, logsigma


# ----------------------------------------------------------------------------
# Deterministic synthetic params (torch-layout shapes, as in module __init__)
# ----------------------------------------------------------------------------
def init_raw_params(key, img_channels, latent_size):
    scale = 0.05

    def nrm(k, shape):
        return scale * jax.random.normal(k, shape, dtype=jnp.float32)

    keys = jax.random.split(key, 22)
    ki = iter(keys)
    p = {}
    # Encoder (1d)
    p["conv1_w"] = nrm(next(ki), (32, img_channels, 2)); p["conv1_b"] = nrm(next(ki), (32,))
    p["conv2_w"] = nrm(next(ki), (64, 32, 2));           p["conv2_b"] = nrm(next(ki), (64,))
    p["conv3_w"] = nrm(next(ki), (128, 64, 2));          p["conv3_b"] = nrm(next(ki), (128,))
    p["conv4_w"] = nrm(next(ki), (256, 128, 1));         p["conv4_b"] = nrm(next(ki), (256,))
    p["fc_mu_w"] = nrm(next(ki), (latent_size, 256));    p["fc_mu_b"] = nrm(next(ki), (latent_size,))
    p["fc_ls_w"] = nrm(next(ki), (latent_size, 256));    p["fc_ls_b"] = nrm(next(ki), (latent_size,))
    # Decoder (1d)
    p["fc1_w"] = nrm(next(ki), (1024, latent_size));     p["fc1_b"] = nrm(next(ki), (1024,))
    p["dec1_w"] = nrm(next(ki), (1024, 128, 2));         p["dec1_b"] = nrm(next(ki), (128,))
    p["dec2_w"] = nrm(next(ki), (128, 64, 2));           p["dec2_b"] = nrm(next(ki), (64,))
    p["dec3_w"] = nrm(next(ki), (64, 32, 2));            p["dec3_b"] = nrm(next(ki), (32,))
    p["dec4_w"] = nrm(next(ki), (32, img_channels, 1));  p["dec4_b"] = nrm(next(ki), (img_channels,))
    return p


if __name__ == "__main__":
    img_channels = 3
    latent_size = 32
    batch = 2
    seq_len = 4  # conv stack (k=2,2,2,1) needs L=4 so fc_mu sees 256 features

    root = jax.random.PRNGKey(0)
    k_x, k_eps, k_params = jax.random.split(root, 3)

    x = jax.random.normal(k_x, (batch, img_channels, seq_len), dtype=jnp.float32)
    eps = jax.random.normal(k_eps, (batch, latent_size), dtype=jnp.float32)
    params = prepare_params(init_raw_params(k_params, img_channels, latent_size),
                            seq_len=seq_len)

    fwd = jax.jit(vae_forward)
    recon, mu, logsigma = fwd(params, x, eps)
    jax.block_until_ready((recon, mu, logsigma))

    assert recon.shape == (batch, img_channels, seq_len), recon.shape
    assert mu.shape == (batch, latent_size), mu.shape
    assert logsigma.shape == (batch, latent_size), logsigma.shape
    assert bool(jnp.all(jnp.isfinite(recon)))
    assert bool(jnp.all(jnp.isfinite(mu))) and bool(jnp.all(jnp.isfinite(logsigma)))
    print("KERNEL_OK")
</pallas_src>

<mosaic_0001>
module attributes {stable_mosaic.version = 11 : i64} {
  func.func @_vae_fused_kernel(%arg0: i32, %arg1: memref<2x12xf32, #tpu.memory_space<vmem>>, %arg2: memref<2x32xf32, #tpu.memory_space<vmem>>, %arg3: memref<12x96xbf16, #tpu.memory_space<vmem>>, %arg4: memref<1x96xf32, #tpu.memory_space<vmem>>, %arg5: memref<96x128xbf16, #tpu.memory_space<vmem>>, %arg6: memref<1x128xf32, #tpu.memory_space<vmem>>, %arg7: memref<128x128xbf16, #tpu.memory_space<vmem>>, %arg8: memref<1x128xf32, #tpu.memory_space<vmem>>, %arg9: memref<128x256xbf16, #tpu.memory_space<vmem>>, %arg10: memref<1x256xf32, #tpu.memory_space<vmem>>, %arg11: memref<256x64xbf16, #tpu.memory_space<vmem>>, %arg12: memref<1x64xf32, #tpu.memory_space<vmem>>, %arg13: memref<32x1024xbf16, #tpu.memory_space<vmem>>, %arg14: memref<1x1024xf32, #tpu.memory_space<vmem>>, %arg15: memref<1024x256xbf16, #tpu.memory_space<vmem>>, %arg16: memref<1x256xf32, #tpu.memory_space<vmem>>, %arg17: memref<256x192xbf16, #tpu.memory_space<vmem>>, %arg18: memref<1x192xf32, #tpu.memory_space<vmem>>, %arg19: memref<192x128xbf16, #tpu.memory_space<vmem>>, %arg20: memref<1x128xf32, #tpu.memory_space<vmem>>, %arg21: memref<128x12xbf16, #tpu.memory_space<vmem>>, %arg22: memref<1x12xf32, #tpu.memory_space<vmem>>, %arg23: memref<2x12xf32, #tpu.memory_space<vmem>>, %arg24: memref<2x32xf32, #tpu.memory_space<vmem>>, %arg25: memref<2x32xf32, #tpu.memory_space<vmem>>) attributes {dimension_semantics = [#tpu.dimension_semantics<parallel>], iteration_bounds = array<i64: 1>, scalar_prefetch = 0 : i64, scratch_operands = 0 : i64, tpu.core_type = #tpu.core_type<tc>, window_params = [{transform_indices = @transform_0, window_bounds = array<i64: 2, 12>}, {transform_indices = @transform_1, window_bounds = array<i64: 2, 32>}, {pipeline_mode = #tpu.pipeline_mode<synchronous>, transform_indices = @transform_2, window_bounds = array<i64: 12, 96>}, {pipeline_mode = #tpu.pipeline_mode<synchronous>, transform_indices = @transform_3, window_bounds = array<i64: 1, 96>}, {pipeline_mode = #tpu.pipeline_mode<synchronous>, transform_indices = @transform_4, window_bounds = array<i64: 96, 128>}, {pipeline_mode = #tpu.pipeline_mode<synchronous>, transform_indices = @transform_5, window_bounds = array<i64: 1, 128>}, {pipeline_mode = #tpu.pipeline_mode<synchronous>, transform_indices = @transform_6, window_bounds = array<i64: 128, 128>}, {pipeline_mode = #tpu.pipeline_mode<synchronous>, transform_indices = @transform_7, window_bounds = array<i64: 1, 128>}, {pipeline_mode = #tpu.pipeline_mode<synchronous>, transform_indices = @transform_8, window_bounds = array<i64: 128, 256>}, {pipeline_mode = #tpu.pipeline_mode<synchronous>, transform_indices = @transform_9, window_bounds = array<i64: 1, 256>}, {pipeline_mode = #tpu.pipeline_mode<synchronous>, transform_indices = @transform_10, window_bounds = array<i64: 256, 64>}, {pipeline_mode = #tpu.pipeline_mode<synchronous>, transform_indices = @transform_11, window_bounds = array<i64: 1, 64>}, {pipeline_mode = #tpu.pipeline_mode<synchronous>, transform_indices = @transform_12, window_bounds = array<i64: 32, 1024>}, {pipeline_mode = #tpu.pipeline_mode<synchronous>, transform_indices = @transform_13, window_bounds = array<i64: 1, 1024>}, {pipeline_mode = #tpu.pipeline_mode<synchronous>, transform_indices = @transform_14, window_bounds = array<i64: 1024, 256>}, {pipeline_mode = #tpu.pipeline_mode<synchronous>, transform_indices = @transform_15, window_bounds = array<i64: 1, 256>}, {pipeline_mode = #tpu.pipeline_mode<synchronous>, transform_indices = @transform_16, window_bounds = array<i64: 256, 192>}, {pipeline_mode = #tpu.pipeline_mode<synchronous>, transform_indices = @transform_17, window_bounds = array<i64: 1, 192>}, {pipeline_mode = #tpu.pipeline_mode<synchronous>, transform_indices = @transform_18, window_bounds = array<i64: 192, 128>}, {pipeline_mode = #tpu.pipeline_mode<synchronous>, transform_indices = @transform_19, window_bounds = array<i64: 1, 128>}, {pipeline_mode = #tpu.pipeline_mode<synchronous>, transform_indices = @transform_20, window_bounds = array<i64: 128, 12>}, {pipeline_mode = #tpu.pipeline_mode<synchronous>, transform_indices = @transform_21, window_bounds = array<i64: 1, 12>}, {transform_indices = @transform_22, window_bounds = array<i64: 2, 12>}, {transform_indices = @transform_23, window_bounds = array<i64: 2, 32>}, {transform_indices = @transform_24, window_bounds = array<i64: 2, 32>}]} {
    %c0 = arith.constant 0 : index
    %c0_0 = arith.constant 0 : index
    %0 = vector.load %arg1[%c0, %c0_0] : memref<2x12xf32, #tpu.memory_space<vmem>>, vector<2x12xf32>
    %1 = arith.truncf %0 : vector<2x12xf32> to vector<2x12xbf16>
    %c0_1 = arith.constant 0 : index
    %c0_2 = arith.constant 0 : index
    %2 = vector.load %arg3[%c0_1, %c0_2] : memref<12x96xbf16, #tpu.memory_space<vmem>>, vector<12x96xbf16>
    %cst = arith.constant dense<0.000000e+00> : vector<2x96xf32>
    %3 = tpu.matmul %1, %2, %cst {dimension_numbers = #tpu.dot_dimension_numbers<[1], [0], [0], [1], [0, 0, 1, 1], [], []>} : vector<2x12xbf16>, vector<12x96xbf16>, vector<2x96xf32> -> vector<2x96xf32>
    %c0_3 = arith.constant 0 : index
    %c0_4 = arith.constant 0 : index
    %4 = vector.load %arg4[%c0_3, %c0_4] : memref<1x96xf32, #tpu.memory_space<vmem>>, vector<1x96xf32>
    %5 = vector.broadcast %4 : vector<1x96xf32> to vector<2x96xf32>
    %6 = arith.addf %3, %5 : vector<2x96xf32>
    %cst_5 = arith.constant 0.000000e+00 : f32
    %7 = vector.broadcast %cst_5 : f32 to vector<2x96xf32>
    %8 = arith.maximumf %6, %7 : vector<2x96xf32>
    %9 = arith.truncf %8 : vector<2x96xf32> to vector<2x96xbf16>
    %c0_6 = arith.constant 0 : index
    %c0_7 = arith.constant 0 : index
    %10 = vector.load %arg5[%c0_6, %c0_7] : memref<96x128xbf16, #tpu.memory_space<vmem>>, vector<96x128xbf16>
    %cst_8 = arith.constant dense<0.000000e+00> : vector<2x128xf32>
    %11 = tpu.matmul %9, %10, %cst_8 {dimension_numbers = #tpu.dot_dimension_numbers<[1], [0], [0], [1], [0, 0, 1, 1], [], []>} : vector<2x96xbf16>, vector<96x128xbf16>, vector<2x128xf32> -> vector<2x128xf32>
    %c0_9 = arith.constant 0 : index
    %c0_10 = arith.constant 0 : index
    %12 = vector.load %arg6[%c0_9, %c0_10] : memref<1x128xf32, #tpu.memory_space<vmem>>, vector<1x128xf32>
    %13 = vector.broadcast %12 : vector<1x128xf32> to vector<2x128xf32>
    %14 = arith.addf %11, %13 : vector<2x128xf32>
    %cst_11 = arith.constant 0.000000e+00 : f32
    %15 = vector.broadcast %cst_11 : f32 to vector<2x128xf32>
    %16 = arith.maximumf %14, %15 : vector<2x128xf32>
    %17 = arith.truncf %16 : vector<2x128xf32> to vector<2x128xbf16>
    %c0_12 = arith.constant 0 : index
    %c0_13 = arith.constant 0 : index
    %18 = vector.load %arg7[%c0_12, %c0_13] : memref<128x128xbf16, #tpu.memory_space<vmem>>, vector<128x128xbf16>
    %cst_14 = arith.constant dense<0.000000e+00> : vector<2x128xf32>
    %19 = tpu.matmul %17, %18, %cst_14 {dimension_numbers = #tpu.dot_dimension_numbers<[1], [0], [0], [1], [0, 0, 1, 1], [], []>} : vector<2x128xbf16>, vector<128x128xbf16>, vector<2x128xf32> -> vector<2x128xf32>
    %c0_15 = arith.constant 0 : index
    %c0_16 = arith.constant 0 : index
    %20 = vector.load %arg8[%c0_15, %c0_16] : memref<1x128xf32, #tpu.memory_space<vmem>>, vector<1x128xf32>
    %21 = vector.broadcast %20 : vector<1x128xf32> to vector<2x128xf32>
    %22 = arith.addf %19, %21 : vector<2x128xf32>
    %cst_17 = arith.constant 0.000000e+00 : f32
    %23 = vector.broadcast %cst_17 : f32 to vector<2x128xf32>
    %24 = arith.maximumf %22, %23 : vector<2x128xf32>
    %25 = arith.truncf %24 : vector<2x128xf32> to vector<2x128xbf16>
    %c0_18 = arith.constant 0 : index
    %c0_19 = arith.constant 0 : index
    %26 = vector.load %arg9[%c0_18, %c0_19] : memref<128x256xbf16, #tpu.memory_space<vmem>>, vector<128x256xbf16>
    %cst_20 = arith.constant dense<0.000000e+00> : vector<2x256xf32>
    %27 = tpu.matmul %25, %26, %cst_20 {dimension_numbers = #tpu.dot_dimension_numbers<[1], [0], [0], [1], [0, 0, 1, 1], [], []>} : vector<2x128xbf16>, vector<128x256xbf16>, vector<2x256xf32> -> vector<2x256xf32>
    %c0_21 = arith.constant 0 : index
    %c0_22 = arith.constant 0 : index
    %28 = vector.load %arg10[%c0_21, %c0_22] : memref<1x256xf32, #tpu.memory_space<vmem>>, vector<1x256xf32>
    %29 = vector.broadcast %28 : vector<1x256xf32> to vector<2x256xf32>
    %30 = arith.addf %27, %29 : vector<2x256xf32>
    %cst_23 = arith.constant 0.000000e+00 : f32
    %31 = vector.broadcast %cst_23 : f32 to vector<2x256xf32>
    %32 = arith.maximumf %30, %31 : vector<2x256xf32>
    %33 = arith.truncf %32 : vector<2x256xf32> to vector<2x256xbf16>
    %c0_24 = arith.constant 0 : index
    %c0_25 = arith.constant 0 : index
    %34 = vector.load %arg11[%c0_24, %c0_25] : memref<256x64xbf16, #tpu.memory_space<vmem>>, vector<256x64xbf16>
    %cst_26 = arith.constant dense<0.000000e+00> : vector<2x64xf32>
    %35 = tpu.matmul %33, %34, %cst_26 {dimension_numbers = #tpu.dot_dimension_numbers<[1], [0], [0], [1], [0, 0, 1, 1], [], []>} : vector<2x256xbf16>, vector<256x64xbf16>, vector<2x64xf32> -> vector<2x64xf32>
    %c0_27 = arith.constant 0 : index
    %c0_28 = arith.constant 0 : index
    %36 = vector.load %arg12[%c0_27, %c0_28] : memref<1x64xf32, #tpu.memory_space<vmem>>, vector<1x64xf32>
    %37 = vector.broadcast %36 : vector<1x64xf32> to vector<2x64xf32>
    %38 = arith.addf %35, %37 : vector<2x64xf32>
    %39 = vector.extract_strided_slice %38 {offsets = [0, 0], sizes = [2, 32], strides = [1, 1]} : vector<2x64xf32> to vector<2x32xf32>
    %40 = vector.extract_strided_slice %38 {offsets = [0, 32], sizes = [2, 32], strides = [1, 1]} : vector<2x64xf32> to vector<2x32xf32>
    %c0_29 = arith.constant 0 : index
    %c0_30 = arith.constant 0 : index
    %41 = vector.load %arg24[%c0_29, %c0_30] : memref<2x32xf32, #tpu.memory_space<vmem>>, vector<2x32xf32>
    tpu.vector_store %arg24[%c0_29, %c0_30], %39 {strides = array<i32>} : memref<2x32xf32, #tpu.memory_space<vmem>>, vector<2x32xf32>,
    %c0_31 = arith.constant 0 : index
    %c0_32 = arith.constant 0 : index
    %42 = vector.load %arg25[%c0_31, %c0_32] : memref<2x32xf32, #tpu.memory_space<vmem>>, vector<2x32xf32>
    tpu.vector_store %arg25[%c0_31, %c0_32], %40 {strides = array<i32>} : memref<2x32xf32, #tpu.memory_space<vmem>>, vector<2x32xf32>,
    %c0_33 = arith.constant 0 : index
    %c0_34 = arith.constant 0 : index
    %43 = vector.load %arg2[%c0_33, %c0_34] : memref<2x32xf32, #tpu.memory_space<vmem>>, vector<2x32xf32>
    %44 = math.exp %40 : vector<2x32xf32>
    %45 = arith.mulf %43, %44 : vector<2x32xf32>
    %46 = arith.addf %45, %39 : vector<2x32xf32>
    %47 = arith.truncf %46 : vector<2x32xf32> to vector<2x32xbf16>
    %c0_35 = arith.constant 0 : index
    %c0_36 = arith.constant 0 : index
    %48 = vector.load %arg13[%c0_35, %c0_36] : memref<32x1024xbf16, #tpu.memory_space<vmem>>, vector<32x1024xbf16>
    %cst_37 = arith.constant dense<0.000000e+00> : vector<2x1024xf32>
    %49 = tpu.matmul %47, %48, %cst_37 {dimension_numbers = #tpu.dot_dimension_numbers<[1], [0], [0], [1], [0, 0, 1, 1], [], []>} : vector<2x32xbf16>, vector<32x1024xbf16>, vector<2x1024xf32> -> vector<2x1024xf32>
    %c0_38 = arith.constant 0 : index
    %c0_39 = arith.constant 0 : index
    %50 = vector.load %arg14[%c0_38, %c0_39] : memref<1x1024xf32, #tpu.memory_space<vmem>>, vector<1x1024xf32>
    %51 = vector.broadcast %50 : vector<1x1024xf32> to vector<2x1024xf32>
    %52 = arith.addf %49, %51 : vector<2x1024xf32>
    %cst_40 = arith.constant 0.000000e+00 : f32
    %53 = vector.broadcast %cst_40 : f32 to vector<2x1024xf32>
    %54 = arith.maximumf %52, %53 : vector<2x1024xf32>
    %55 = arith.truncf %54 : vector<2x1024xf32> to vector<2x1024xbf16>
    %c0_41 = arith.constant 0 : index
    %c0_42 = arith.constant 0 : index
    %56 = vector.load %arg15[%c0_41, %c0_42] : memref<1024x256xbf16, #tpu.memory_space<vmem>>, vector<1024x256xbf16>
    %cst_43 = arith.constant dense<0.000000e+00> : vector<2x256xf32>
    %57 = tpu.matmul %55, %56, %cst_43 {dimension_numbers = #tpu.dot_dimension_numbers<[1], [0], [0], [1], [0, 0, 1, 1], [], []>} : vector<2x1024xbf16>, vector<1024x256xbf16>, vector<2x256xf32> -> vector<2x256xf32>
    %c0_44 = arith.constant 0 : index
    %c0_45 = arith.constant 0 : index
    %58 = vector.load %arg16[%c0_44, %c0_45] : memref<1x256xf32, #tpu.memory_space<vmem>>, vector<1x256xf32>
    %59 = vector.broadcast %58 : vector<1x256xf32> to vector<2x256xf32>
    %60 = arith.addf %57, %59 : vector<2x256xf32>
    %cst_46 = arith.constant 0.000000e+00 : f32
    %61 = vector.broadcast %cst_46 : f32 to vector<2x256xf32>
    %62 = arith.maximumf %60, %61 : vector<2x256xf32>
    %63 = arith.truncf %62 : vector<2x256xf32> to vector<2x256xbf16>
    %c0_47 = arith.constant 0 : index
    %c0_48 = arith.constant 0 : index
    %64 = vector.load %arg17[%c0_47, %c0_48] : memref<256x192xbf16, #tpu.memory_space<vmem>>, vector<256x192xbf16>
    %cst_49 = arith.constant dense<0.000000e+00> : vector<2x192xf32>
    %65 = tpu.matmul %63, %64, %cst_49 {dimension_numbers = #tpu.dot_dimension_numbers<[1], [0], [0], [1], [0, 0, 1, 1], [], []>} : vector<2x256xbf16>, vector<256x192xbf16>, vector<2x192xf32> -> vector<2x192xf32>
    %c0_50 = arith.constant 0 : index
    %c0_51 = arith.constant 0 : index
    %66 = vector.load %arg18[%c0_50, %c0_51] : memref<1x192xf32, #tpu.memory_space<vmem>>, vector<1x192xf32>
    %67 = vector.broadcast %66 : vector<1x192xf32> to vector<2x192xf32>
    %68 = arith.addf %65, %67 : vector<2x192xf32>
    %cst_52 = arith.constant 0.000000e+00 : f32
    %69 = vector.broadcast %cst_52 : f32 to vector<2x192xf32>
    %70 = arith.maximumf %68, %69 : vector<2x192xf32>
    %71 = arith.truncf %70 : vector<2x192xf32> to vector<2x192xbf16>
    %c0_53 = arith.constant 0 : index
    %c0_54 = arith.constant 0 : index
    %72 = vector.load %arg19[%c0_53, %c0_54] : memref<192x128xbf16, #tpu.memory_space<vmem>>, vector<192x128xbf16>
    %cst_55 = arith.constant dense<0.000000e+00> : vector<2x128xf32>
    %73 = tpu.matmul %71, %72, %cst_55 {dimension_numbers = #tpu.dot_dimension_numbers<[1], [0], [0], [1], [0, 0, 1, 1], [], []>} : vector<2x192xbf16>, vector<192x128xbf16>, vector<2x128xf32> -> vector<2x128xf32>
    %c0_56 = arith.constant 0 : index
    %c0_57 = arith.constant 0 : index
    %74 = vector.load %arg20[%c0_56, %c0_57] : memref<1x128xf32, #tpu.memory_space<vmem>>, vector<1x128xf32>
    %75 = vector.broadcast %74 : vector<1x128xf32> to vector<2x128xf32>
    %76 = arith.addf %73, %75 : vector<2x128xf32>
    %cst_58 = arith.constant 0.000000e+00 : f32
    %77 = vector.broadcast %cst_58 : f32 to vector<2x128xf32>
    %78 = arith.maximumf %76, %77 : vector<2x128xf32>
    %79 = arith.truncf %78 : vector<2x128xf32> to vector<2x128xbf16>
    %c0_59 = arith.constant 0 : index
    %c0_60 = arith.constant 0 : index
    %80 = vector.load %arg21[%c0_59, %c0_60] : memref<128x12xbf16, #tpu.memory_space<vmem>>, vector<128x12xbf16>
    %cst_61 = arith.constant dense<0.000000e+00> : vector<2x12xf32>
    %81 = tpu.matmul %79, %80, %cst_61 {dimension_numbers = #tpu.dot_dimension_numbers<[1], [0], [0], [1], [0, 0, 1, 1], [], []>} : vector<2x128xbf16>, vector<128x12xbf16>, vector<2x12xf32> -> vector<2x12xf32>
    %c0_62 = arith.constant 0 : index
    %c0_63 = arith.constant 0 : index
    %82 = vector.load %arg22[%c0_62, %c0_63] : memref<1x12xf32, #tpu.memory_space<vmem>>, vector<1x12xf32>
    %83 = vector.broadcast %82 : vector<1x12xf32> to vector<2x12xf32>
    %84 = arith.addf %81, %83 : vector<2x12xf32>
    %c0_64 = arith.constant 0 : index
    %c0_65 = arith.constant 0 : index
    %85 = vector.load %arg23[%c0_64, %c0_65] : memref<2x12xf32, #tpu.memory_space<vmem>>, vector<2x12xf32>
    tpu.vector_store %arg23[%c0_64, %c0_65], %84 {strides = array<i32>} : memref<2x12xf32, #tpu.memory_space<vmem>>, vector<2x12xf32>,
    return
  }
  func.func @transform_0(%arg0: i32) -> (i32, i32) {
    %c0_i32 = arith.constant 0 : i32
    %c0_i32_0 = arith.constant 0 : i32
    return %arg0, %c0_i32 : i32, i32
  }
  func.func @transform_1(%arg0: i32) -> (i32, i32) {
    %c0_i32 = arith.constant 0 : i32
    %c0_i32_0 = arith.constant 0 : i32
    return %arg0, %c0_i32 : i32, i32
  }
  func.func @transform_2(%arg0: i32) -> (i32, i32) {
    %c0_i32 = arith.constant 0 : i32
    %c0_i32_0 = arith.constant 0 : i32
    %c0_i32_1 = arith.constant 0 : i32
    return %c0_i32, %c0_i32_0 : i32, i32
  }
  func.func @transform_3(%arg0: i32) -> (i32, i32) {
    %c0_i32 = arith.constant 0 : i32
    %c0_i32_0 = arith.constant 0 : i32
    %c0_i32_1 = arith.constant 0 : i32
    return %c0_i32, %c0_i32_0 : i32, i32
  }
  func.func @transform_4(%arg0: i32) -> (i32, i32) {
    %c0_i32 = arith.constant 0 : i32
    %c0_i32_0 = arith.constant 0 : i32
    %c0_i32_1 = arith.constant 0 : i32
    return %c0_i32, %c0_i32_0 : i32, i32
  }
  func.func @transform_5(%arg0: i32) -> (i32, i32) {
    %c0_i32 = arith.constant 0 : i32
    %c0_i32_0 = arith.constant 0 : i32
    %c0_i32_1 = arith.constant 0 : i32
    return %c0_i32, %c0_i32_0 : i32, i32
  }
  func.func @transform_6(%arg0: i32) -> (i32, i32) {
    %c0_i32 = arith.constant 0 : i32
    %c0_i32_0 = arith.constant 0 : i32
    %c0_i32_1 = arith.constant 0 : i32
    return %c0_i32, %c0_i32_0 : i32, i32
  }
  func.func @transform_7(%arg0: i32) -> (i32, i32) {
    %c0_i32 = arith.constant 0 : i32
    %c0_i32_0 = arith.constant 0 : i32
    %c0_i32_1 = arith.constant 0 : i32
    return %c0_i32, %c0_i32_0 : i32, i32
  }
  func.func @transform_8(%arg0: i32) -> (i32, i32) {
    %c0_i32 = arith.constant 0 : i32
    %c0_i32_0 = arith.constant 0 : i32
    %c0_i32_1 = arith.constant 0 : i32
    return %c0_i32, %c0_i32_0 : i32, i32
  }
  func.func @transform_9(%arg0: i32) -> (i32, i32) {
    %c0_i32 = arith.constant 0 : i32
    %c0_i32_0 = arith.constant 0 : i32
    %c0_i32_1 = arith.constant 0 : i32
    return %c0_i32, %c0_i32_0 : i32, i32
  }
  func.func @transform_10(%arg0: i32) -> (i32, i32) {
    %c0_i32 = arith.constant 0 : i32
    %c0_i32_0 = arith.constant 0 : i32
    %c0_i32_1 = arith.constant 0 : i32
    return %c0_i32, %c0_i32_0 : i32, i32
  }
  func.func @transform_11(%arg0: i32) -> (i32, i32) {
    %c0_i32 = arith.constant 0 : i32
    %c0_i32_0 = arith.constant 0 : i32
    %c0_i32_1 = arith.constant 0 : i32
    return %c0_i32, %c0_i32_0 : i32, i32
  }
  func.func @transform_12(%arg0: i32) -> (i32, i32) {
    %c0_i32 = arith.constant 0 : i32
    %c0_i32_0 = arith.constant 0 : i32
    %c0_i32_1 = arith.constant 0 : i32
    return %c0_i32, %c0_i32_0 : i32, i32
  }
  func.func @transform_13(%arg0: i32) -> (i32, i32) {
    %c0_i32 = arith.constant 0 : i32
    %c0_i32_0 = arith.constant 0 : i32
    %c0_i32_1 = arith.constant 0 : i32
    return %c0_i32, %c0_i32_0 : i32, i32
  }
  func.func @transform_14(%arg0: i32) -> (i32, i32) {
    %c0_i32 = arith.constant 0 : i32
    %c0_i32_0 = arith.constant 0 : i32
    %c0_i32_1 = arith.constant 0 : i32
    return %c0_i32, %c0_i32_0 : i32, i32
  }
  func.func @transform_15(%arg0: i32) -> (i32, i32) {
    %c0_i32 = arith.constant 0 : i32
    %c0_i32_0 = arith.constant 0 : i32
    %c0_i32_1 = arith.constant 0 : i32
    return %c0_i32, %c0_i32_0 : i32, i32
  }
  func.func @transform_16(%arg0: i32) -> (i32, i32) {
    %c0_i32 = arith.constant 0 : i32
    %c0_i32_0 = arith.constant 0 : i32
    %c0_i32_1 = arith.constant 0 : i32
    return %c0_i32, %c0_i32_0 : i32, i32
  }
  func.func @transform_17(%arg0: i32) -> (i32, i32) {
    %c0_i32 = arith.constant 0 : i32
    %c0_i32_0 = arith.constant 0 : i32
    %c0_i32_1 = arith.constant 0 : i32
    return %c0_i32, %c0_i32_0 : i32, i32
  }
  func.func @transform_18(%arg0: i32) -> (i32, i32) {
    %c0_i32 = arith.constant 0 : i32
    %c0_i32_0 = arith.constant 0 : i32
    %c0_i32_1 = arith.constant 0 : i32
    return %c0_i32, %c0_i32_0 : i32, i32
  }
  func.func @transform_19(%arg0: i32) -> (i32, i32) {
    %c0_i32 = arith.constant 0 : i32
    %c0_i32_0 = arith.constant 0 : i32
    %c0_i32_1 = arith.constant 0 : i32
    return %c0_i32, %c0_i32_0 : i32, i32
  }
  func.func @transform_20(%arg0: i32) -> (i32, i32) {
    %c0_i32 = arith.constant 0 : i32
    %c0_i32_0 = arith.constant 0 : i32
    %c0_i32_1 = arith.constant 0 : i32
    return %c0_i32, %c0_i32_0 : i32, i32
  }
  func.func @transform_21(%arg0: i32) -> (i32, i32) {
    %c0_i32 = arith.constant 0 : i32
    %c0_i32_0 = arith.constant 0 : i32
    %c0_i32_1 = arith.constant 0 : i32
    return %c0_i32, %c0_i32_0 : i32, i32
  }
  func.func @transform_22(%arg0: i32) -> (i32, i32) {
    %c0_i32 = arith.constant 0 : i32
    %c0_i32_0 = arith.constant 0 : i32
    return %arg0, %c0_i32 : i32, i32
  }
  func.func @transform_23(%arg0: i32) -> (i32, i32) {
    %c0_i32 = arith.constant 0 : i32
    %c0_i32_0 = arith.constant 0 : i32
    return %arg0, %c0_i32 : i32, i32
  }
  func.func @transform_24(%arg0: i32) -> (i32, i32) {
    %c0_i32 = arith.constant 0 : i32
    %c0_i32_0 = arith.constant 0 : i32
    return %arg0, %c0_i32 : i32, i32
  }
}

</mosaic_0001>

<bundles_post_ra>
// kernel: vae_forward.1
= control target key start
LH: loop header
LB: loop body
LE: loop exit
PB: predicated region body
PF: predicated region fallthrough
CT: control target
= control target key end

     0   :  { %s3908_s0 = inlined_call_operand.vmem [shape: f32[2,12], index: 0, kind: input, shape index: {}]   ;;  %s3909_s1 = inlined_call_operand.vmem [shape: f32[2,32], index: 1, kind: input, shape index: {}]   ;;  %s3910_s2 = inlined_call_operand.vmem [shape: bf16[12,96], index: 2, kind: input, shape index: {}]   ;;  %s3911_s3 = inlined_call_operand.vmem [shape: f32[1,96], index: 3, kind: input, shape index: {}]   ;;  %s3912_s4 = inlined_call_operand.vmem [shape: bf16[96,128], index: 4, kind: input, shape index: {}]   ;;  %s3913_s5 = inlined_call_operand.vmem [shape: f32[1,128], index: 5, kind: input, shape index: {}]   ;;  %s3914_s6 = inlined_call_operand.vmem [shape: bf16[128,128], index: 6, kind: input, shape index: {}]   ;;  %s3915_s7 = inlined_call_operand.vmem [shape: f32[1,128], index: 7, kind: input, shape index: {}]   ;;  %s3916_s8 = inlined_call_operand.vmem [shape: bf16[128,256], index: 8, kind: input, shape index: {}]   ;;  %s3917_s9 = inlined_call_operand.vmem [shape: f32[1,256], index: 9, kind: input, shape index: {}]   ;;  %s3918_s10 = inlined_call_operand.vmem [shape: bf16[256,64], index: 10, kind: input, shape index: {}]   ;;  %s3919_s11 = inlined_call_operand.vmem [shape: f32[1,64], index: 11, kind: input, shape index: {}]   ;;  %s3920_s12 = inlined_call_operand.vmem [shape: bf16[32,1024], index: 12, kind: input, shape index: {}]   ;;  %s3921_s13 = inlined_call_operand.vmem [shape: f32[1,1024], index: 13, kind: input, shape index: {}]   ;;  %s3922_s14 = inlined_call_operand.hbm [shape: bf16[1024,256], index: 14, kind: input, shape index: {}]   ;;  %s3923_s15 = inlined_call_operand.vmem [shape: f32[1,256], index: 15, kind: input, shape index: {}]   ;;  %s3924_s16 = inlined_call_operand.vmem [shape: bf16[256,192], index: 16, kind: input, shape index: {}]   ;;  %s3925_s17 = inlined_call_operand.vmem [shape: f32[1,192], index: 17, kind: input, shape index: {}]   ;;  %s3926_s18 = inlined_call_operand.vmem [shape: bf16[192,128], index: 18, kind: input, shape index: {}]   ;;  %s3927_s19 = inlined_call_operand.vmem [shape: f32[1,128], index: 19, kind: input, shape index: {}]   ;;  %s3928_s20 = inlined_call_operand.vmem [shape: bf16[128,12], index: 20, kind: input, shape index: {}]   ;;  %s3929_s21 = inlined_call_operand.vmem [shape: f32[1,12], index: 21, kind: input, shape index: {}]   ;;  %s3930_s22 = inlined_call_operand.vmem [shape: f32[2,12], index: 22, kind: output, shape index: {0}]   ;;  %s3931_s23 = inlined_call_operand.hbm [shape: f32[2,32], index: 23, kind: output, shape index: {1}]   ;;  %s3932_s24 = inlined_call_operand.hbm [shape: f32[2,32], index: 24, kind: output, shape index: {2}]  }
   0x1   :  { %3936 = sst [smem:[#allocation11_spill]] %s3908_s0 }
   0x2   :  { %3937 = sst [smem:[#allocation12_spill]] %s3909_s1 }
   0x3   :  { %3938 = sst [smem:[#allocation13_spill]] %s3910_s2 }
   0x4   :  { %3939 = sst [smem:[#allocation14_spill]] %s3911_s3 }
   0x5   :  { %3940 = sst [smem:[#allocation15_spill]] %s3912_s4 }
   0x6   :  { %3941 = sst [smem:[#allocation16_spill]] %s3913_s5 }
   0x7   :  { %3942 = sst [smem:[#allocation17_spill]] %s3914_s6 }
   0x8   :  { %3943 = sst [smem:[#allocation18_spill]] %s3915_s7 }
   0x9   :  { %3944 = sst [smem:[#allocation19_spill]] %s3916_s8 }
   0xa   :  { %30 = vsyncpa [#allocation3], 0 }
   0xb   :  { %31 = vsyncpa [#allocation4], 0 }
   0xc   :  { %32 = vsyncpa [#allocation7], 0  ;;  %s3289_s5 = smov [#allocation2]  }
   0xd   :  { %s66_s26 = sshll.u32 %s3289_s5, 4  ;;  %s67_s26 = int_to_ptr.vmem [resolvable:$true] %s66_s26 }
   0xe   :  { %s3231_s27 = scalar_lea.vmem %s67_s26, 16384  ;;  %p3236_p1 = scmp.lt.s32.totalorder %s67_s26, %s67_s26 }
   0xf   :  { %p3232_p0 = scmp.ne.s32.totalorder %s67_s26, %s3231_s27  ;;  %p3237_p2 = scmp.lt.s32.totalorder %s3231_s27, %s3231_s27 }
  0x11   :  { %p3238_p3 = por %p3237_p2, %p3236_p1 }
  0x13   :  { %p3239_p4 = pnand %p3238_p3, %p3232_p0 }
  0x15   :  { %3242 = shalt.err (!%p3239_p4)
}
  0x16   :  { %s3290_s28 = smov 128   ;;  %s3291_s6 = smov 8  }
  0x17   :  { %72 = dma.hbm_to_vmem [thread:$0]  %s3922_s14, 16384, %s67_s26, [#allocation3], %s3290_s28, %s3290_s28, %s3291_s6  }
  0x18   :  { %3283 = dma.done.wait [#allocation3], 16384  }
  0x19   :  { %3284 = vsyncadd [#allocation3], 4294950912  ;;  %v3292_v0 = vmov 0.0   ;;  %vm3293_vm0 = vmmov 0   ;;  %vm111_vm1 = vcmask 1045504   ;;  %s3945_s30 = sld [smem:[#allocation13_spill]] }
  0x1a   :  { %2835 = vmatprep.subr.bf16.mxu0 %v3292_v0  ;;  %2837 = vmatprep.mubr.msk.bf16.mxu0 %vm3293_vm0, %v3292_v0  ;;  %s3946_s25 = sld [smem:[#allocation11_spill]]  ;;  %vm107_vm2 = vcmask 97280   ;;  %vm212_vm3 = vcmask 785408   ;;  %v3294_v51 = vmov 0   ;;  %v2945_v52 = vld [vmem:[%s3918_s10 + $0x78] sm:$0xff]   ;;  %v2947_v54 = vld [vmem:[%s3918_s10 + $0x70] sm:$0xff]  }
  0x1b   :  { %2841 = vmatprep.subr.bf16.mxu1 %v3292_v0  ;;  %2853 = vmatprep.mubr.msk.bf16.mxu1 %vm3293_vm0, %v3292_v0  ;;  %s3947_s1 = sld [smem:[#allocation15_spill]]  ;;  %v2946_v53 = vld [vmem:[%s3918_s10 + $0x38] sm:$0xff]   ;;  %v2948_v55 = vld [vmem:[%s3918_s10 + $0x30] sm:$0xff]   ;;  %v2949_v56 = vld [vmem:[%s3918_s10 + $0x68] sm:$0xff]   ;;  %vm699_vm4 = vcmask 254976   ;;  %vm854_vm5 = vcmask 261120  }
  0x1c   :  { %s3951_s5 = sld [smem:[#allocation16_spill]]  ;;  %v2950_v57 = vld [vmem:[%s3918_s10 + $0x28] sm:$0xff]   ;;  %v2951_v58 = vld [vmem:[%s3918_s10 + $0x60] sm:$0xff]   ;;  %v2953_v60 = vld [vmem:[%s3918_s10 + $0x58] sm:$0xff]   ;;  %vm2338_vm6 = vcmask 523264  }
  0x1d   :  { %v2952_v59 = vld [vmem:[%s3918_s10 + $0x20] sm:$0xff]   ;;  %v2954_v61 = vld [vmem:[%s3918_s10 + $0x18] sm:$0xff]   ;;  %v2955_v62 = vld [vmem:[%s3918_s10 + $0x50] sm:$0xff]   ;;  %s3952_s4 = sld [smem:[#allocation18_spill]] }
  0x1e   :  { %v2956_v63 = vld [vmem:[%s3918_s10 + $0x10] sm:$0xff]   ;;  %s3953_s27 = sld [smem:[#allocation12_spill]] }
  0x1f   :  { %v2906_v1 = vld [vmem:[%s3945_s30] sm:$0x3f]   ;;  %s3949_s30 = sld [smem:[#allocation14_spill]] }
  0x20   :  { %v91_v2 = vld [vmem:[%s3946_s25] sm:$0x3]  ;;  %v113_v3 = vsel %vm111_vm1, %v2906_v1, 0  ;;  %s3948_s25 = sld [smem:[#allocation17_spill]] }
  0x21   :  { %v92_v4 = vpack.c.bf16 %v91_v2, %v91_v2  ;;  %v2907_v5 = vld [vmem:[%s3947_s1 + $0x28] sm:$0xff]   ;;  %2836 = vmatpush3.bf16.msra.mxu0 %v113_v3  ;;  %v2908_v6 = vld [vmem:[%s3947_s1 + $0x20] sm:$0xff]   ;;  %v2909_v7 = vld [vmem:[%s3947_s1 + $0x18] sm:$0xff]  }
  0x22   :  { %2842 = vmatpush3.bf16.msra.mxu1 %v2907_v5  ;;  %2857 = vmatprep.subr.bf16.mxu0 %v3292_v0  ;;  %v2910_v8 = vld [vmem:[%s3947_s1 + $0x10] sm:$0xff]   ;;  %v2911_v9 = vld [vmem:[%s3947_s1 + $0x8] sm:$0xff]   ;;  %v2912_v10 = vld [vmem:[%s3947_s1] sm:$0xff]   ;;  %s3950_s1 = sld [smem:[#allocation19_spill]] }
  0x23   :  { %2843 = vmatprep.subr.bf16.mxu1 %v3292_v0  ;;  %v2533_v41 = vld [vmem:[%s3951_s5] ss:$0 sm:$0xff] }
  0x24   :  { %2838 = vmatmul.mubr.msk.bf16.vlgmr.msra.gmra.mxu0 %vm107_vm2, %v92_v4  ;;  %v2541_v1 = vld [vmem:[%s3952_s4] ss:$0 sm:$0xff]  ;;  %s3295_s4 = smov 96  }
  0x25   :  { %2873 = vmatprep.mubr.msk.bf16.mxu0 %vm3293_vm0, %v3292_v0  ;;  %v2530_v17 = vld [vmem:[%s3949_s30] ss:$0 sm:$0xff] }
  0x26   :  { %2844 = vmatpush3.bf16.msra.mxu1 %v2908_v6  ;;  %v2913_v11 = vld [vmem:[%s3948_s25 + $0x38] sm:$0xff]   ;;  %v2914_v12 = vld [vmem:[%s3948_s25 + $0x30] sm:$0xff]   ;;  %v2915_v13 = vld [vmem:[%s3948_s25 + $0x28] sm:$0xff]  }
  0x27   :  { %2845 = vmatprep.subr.bf16.mxu1 %v3292_v0  ;;  %2858 = vmatpush3.bf16.msra.mxu0 %v2913_v11  ;;  %v2916_v14 = vld [vmem:[%s3948_s25 + $0x20] sm:$0xff]   ;;  %v2917_v15 = vld [vmem:[%s3948_s25 + $0x18] sm:$0xff]   ;;  %v2918_v16 = vld [vmem:[%s3948_s25 + $0x10] sm:$0xff]  }
  0x28   :  { %2859 = vmatprep.subr.bf16.mxu0 %v3292_v0  ;;  %v2919_v25 = vld [vmem:[%s3948_s25 + $0x8] sm:$0xff]   ;;  %v2920_v26 = vld [vmem:[%s3948_s25] sm:$0xff]   ;;  %v2921_v27 = vld [vmem:[%s3950_s1 + $0x70] ss:$8 sps:$4 sm:$0xff]  }
  0x29   :  { %v2923_v28 = vld [vmem:[%s3950_s1 + $0x74] ss:$8 sps:$4 sm:$0xff]   ;;  %v2926_v29 = vld [vmem:[%s3950_s1 + $0x64] ss:$8 sps:$4 sm:$0xff]   ;;  %v2924_v30 = vld [vmem:[%s3950_s1 + $0x60] ss:$8 sps:$4 sm:$0xff]  }
  0x2a   :  { %2846 = vmatpush3.bf16.msra.mxu1 %v2909_v7  ;;  %v2929_v31 = vld [vmem:[%s3950_s1 + $0x54] ss:$8 sps:$4 sm:$0xff]   ;;  %v2927_v32 = vld [vmem:[%s3950_s1 + $0x50] ss:$8 sps:$4 sm:$0xff]   ;;  %v2932_v33 = vld [vmem:[%s3950_s1 + $0x44] ss:$8 sps:$4 sm:$0xff]  }
  0x2b   :  { %2847 = vmatprep.subr.bf16.mxu1 %v3292_v0  ;;  %2860 = vmatpush3.bf16.msra.mxu0 %v2914_v12  ;;  %v2930_v34 = vld [vmem:[%s3950_s1 + $0x40] ss:$8 sps:$4 sm:$0xff]   ;;  %v2935_v35 = vld [vmem:[%s3950_s1 + $0x34] ss:$8 sps:$4 sm:$0xff]   ;;  %v2933_v36 = vld [vmem:[%s3950_s1 + $0x30] ss:$8 sps:$4 sm:$0xff]  }
  0x2c   :  { %2861 = vmatprep.subr.bf16.mxu0 %v3292_v0  ;;  %v2938_v37 = vld [vmem:[%s3950_s1 + $0x24] ss:$8 sps:$4 sm:$0xff]   ;;  %v2936_v38 = vld [vmem:[%s3950_s1 + $0x20] ss:$8 sps:$4 sm:$0xff]   ;;  %v2941_v39 = vld [vmem:[%s3950_s1 + $0x14] ss:$8 sps:$4 sm:$0xff]  }
  0x2d   :  { %v2939_v40 = vld [vmem:[%s3950_s1 + $0x10] ss:$8 sps:$4 sm:$0xff]   ;;  %v2944_v49 = vld [vmem:[%s3950_s1 + $0x4] ss:$8 sps:$4 sm:$0xff]   ;;  %v2942_v50 = vld [vmem:[%s3950_s1] ss:$8 sps:$4 sm:$0xff]  }
  0x2e   :  { %2848 = vmatpush3.bf16.msra.mxu1 %v2910_v8  ;;  %v2959_v11 = vld [vmem:[%s3918_s10 + $0x40] sm:$0xff]  }
  0x2f   :  { %2849 = vmatprep.subr.bf16.mxu1 %v3292_v0  ;;  %2862 = vmatpush3.bf16.msra.mxu0 %v2915_v13  ;;  %v2960_v12 = vld [vmem:[%s3918_s10] sm:$0xff]   ;;  %v389_v13 = vlaneseq }
  0x30   :  { %2863 = vmatprep.subr.bf16.mxu0 %v3292_v0 }
  0x32   :  { %2850 = vmatpush3.bf16.msra.mxu1 %v2911_v9  ;;  %v2957_v9 = vld [vmem:[%s3918_s10 + $0x48] sm:$0xff]  }
  0x33   :  { %2851 = vmatprep.subr.bf16.mxu1 %v3292_v0  ;;  %2864 = vmatpush3.bf16.msra.mxu0 %v2916_v14  ;;  %v3602_v14 = vshrl.u32 %v389_v13, 7 }
  0x34   :  { %2865 = vmatprep.subr.bf16.mxu0 %v3292_v0 }
  0x36   :  { %2852 = vmatpush3.bf16.msra.mxu1 %v2912_v10  ;;  %v2958_v10 = vld [vmem:[%s3918_s10 + $0x8] sm:$0xff]   ;;  %s3297_s10 = smov [#allocation6]  }
  0x37   :  { %2866 = vmatpush3.bf16.msra.mxu0 %v2917_v15  ;;  %479 = vmatprep.subr.bf16.mxu1 %v2923_v28  ;;  %v3605_v15 = vsub.s32 0, %v3602_v14  ;;  %s2515_s30 = sshll.u32 %s3297_s10, 4  ;;  %s2516_s30 = int_to_ptr.vmem [resolvable:$true] %s2515_s30 }
  0x38   :  { %2867 = vmatprep.subr.bf16.mxu0 %v3292_v0 }
  0x3b   :  { %2868 = vmatpush3.bf16.msra.mxu0 %v2918_v16  ;;  %v387_v16 = vld [vmem:[%s3917_s9] sm:$0x3] }
  0x3c   :  { %2869 = vmatprep.subr.bf16.mxu0 %v3292_v0 }
  0x3f   :  { %2870 = vmatpush3.bf16.msra.mxu0 %v2919_v25 }
  0x40   :  { %2871 = vmatprep.subr.bf16.mxu0 %v3292_v0 }
  0x43   :  { %2872 = vmatpush3.bf16.msra.mxu0 %v2920_v26 }
  0x44   :  { %2804 = vmatprep.subr.bf16.mxu0 %v2945_v52 }
  0xe4   :  { %v149_v18 = vpop.f32.mrf.mxu0 }
  0xe5   :  { %v150_v19 = vadd.f32 %v2530_v17, %v149_v18  ;;  %v3611_v17 = vsub.s32 1, %v3602_v14  ;;  %v392_v18 = vrot.slane %v387_v16, %v3605_v15 }
  0xe6   :  { %v2839_v20 = vpop.f32.mrf.mxu0 }
  0xe7   :  { %v155_v21 = vmax.f32 %v150_v19, 0.0  ;;  %v396_v19 = vrot.slane %v387_v16, %v3611_v17 }
  0xe8   :  { %v152_v22 = vpop.f32.mrf.mxu0 }
  0xe9   :  { %v156_v23 = vpack.c.bf16 %v155_v21, %v155_v21 }
  0xea   :  { %v2840_v24 = vpop.f32.mrf.mxu0 }
  0xeb   :  { %2854 = vmatmul.mubr.msk.bf16.vlgmr.msra.gmra.mxu1 %vm212_vm3, %v156_v23 }
  0xec   :  { %480 = vmatpush1.bf16.msra.mxu1 %v2921_v27  ;;  %511 = vmatprep.mubr.bf16.mxu1 %v3294_v51 }
  0xed   :  { %481 = vmatprep.subr.bf16.mxu1 %v2926_v29 }
  0xf0   :  { %482 = vmatpush1.bf16.msra.mxu1 %v2924_v30  ;;  %v724_v30 = vld [vmem:[%s3920_s12 + $0x40] sm:$0xff] }
  0xf1   :  { %483 = vmatprep.subr.bf16.mxu1 %v2929_v31  ;;  %v728_v31 = vld [vmem:[%s3920_s12 + $0x60] sm:$0xff] }
  0xf4   :  { %484 = vmatpush1.bf16.msra.mxu1 %v2927_v32  ;;  %v725_v32 = vld [vmem:[%s3920_s12 + $0x48] sm:$0xff] }
  0xf5   :  { %485 = vmatprep.subr.bf16.mxu1 %v2932_v33  ;;  %v2591_v33 = vcombine.low %v724_v30, %v728_v31 }
  0xf8   :  { %486 = vmatpush1.bf16.msra.mxu1 %v2930_v34  ;;  %v2592_v34 = vcombine.high %v724_v30, %v728_v31  ;;  %v2981_v30 = vld [vmem:[#allocation2 + $0x44] ss:$8 sps:$4 sm:$0xff]  }
  0xf9   :  { %487 = vmatprep.subr.bf16.mxu1 %v2935_v35  ;;  %v729_v35 = vld [vmem:[%s3920_s12 + $0x68] sm:$0xff] }
  0xfa   :  { %v2984_v31 = vld [vmem:[#allocation2 + $0x144] ss:$8 sps:$4 sm:$0xff]  }
  0xfc   :  { %488 = vmatpush1.bf16.msra.mxu1 %v2933_v36  ;;  %v2593_v36 = vcombine.low %v725_v32, %v729_v35 }
  0xfd   :  { %489 = vmatprep.subr.bf16.mxu1 %v2938_v37  ;;  %v2594_v37 = vcombine.high %v725_v32, %v729_v35  ;;  %v2979_v32 = vld [vmem:[#allocation2 + $0x40] ss:$8 sps:$4 sm:$0xff]   ;;  %v2990_v35 = vld [vmem:[#allocation2 + $0x134] ss:$8 sps:$4 sm:$0xff]  }
 0x100   :  { %490 = vmatpush1.bf16.msra.mxu1 %v2936_v38 }
 0x101   :  { %491 = vmatprep.subr.bf16.mxu1 %v2941_v39  ;;  %v2566_v39 = vld [vmem:[%s3919_s11] ss:$0 sm:$0xff] }
 0x104   :  { %492 = vmatpush1.bf16.msra.mxu1 %v2939_v40 }
 0x105   :  { %493 = vmatprep.subr.bf16.mxu1 %v2944_v49 }
 0x108   :  { %494 = vmatpush1.bf16.msra.mxu1 %v2942_v50  ;;  %v721_v50 = vld [vmem:[%s3920_s12 + $0x28] sm:$0xff] }
 0x109   :  { %911 = vmatprep.subr.bf16.mxu1 %v2594_v37  ;;  %v2988_v37 = vld [vmem:[#allocation2 + $0x130] ss:$8 sps:$4 sm:$0xff]  }
 0x1ab   :  { %v250_v42 = vpop.f32.mrf.mxu1 }
 0x1ac   :  { %v251_v43 = vadd.f32 %v2533_v41, %v250_v42 }
 0x1ad   :  { %v2855_v44 = vpop.f32.mrf.mxu1 }
 0x1ae   :  { %v256_v45 = vmax.f32 %v251_v43, 0.0 }
 0x1af   :  { %v253_v46 = vpop.f32.mrf.mxu1 }
 0x1b0   :  { %v257_v47 = vpack.c.bf16 %v256_v45, %v256_v45  ;;  %v716_v46 = vld [vmem:[%s3920_s12] sm:$0xff] }
 0x1b1   :  { %v2856_v48 = vpop.f32.mrf.mxu1 }
 0x1b2   :  { %2874 = vmatmul.mubr.bf16.vlgmr.msra.gmra.mxu0 %v257_v47  ;;  %v720_v47 = vld [vmem:[%s3920_s12 + $0x20] sm:$0xff]  ;;  %v717_v48 = vld [vmem:[%s3920_s12 + $0x8] sm:$0xff] }
 0x1b3   :  { %2805 = vmatpush3.bf16.msra.mxu0 %v2946_v53  ;;  %v2584_v49 = vcombine.high %v716_v46, %v720_v47  ;;  %v2583_v52 = vcombine.low %v716_v46, %v720_v47  ;;  %v2585_v53 = vcombine.low %v717_v48, %v721_v50  ;;  %v3005_v46 = vld [vmem:[#allocation2 + $0x4] ss:$8 sps:$4 sm:$0xff]  }
 0x1b4   :  { %2806 = vmatprep.subr.bf16.mxu0 %v2947_v54  ;;  %v2586_v54 = vcombine.high %v717_v48, %v721_v50  ;;  %v3008_v47 = vld [vmem:[#allocation2 + $0x104] ss:$8 sps:$4 sm:$0xff]   ;;  %v3003_v48 = vld [vmem:[#allocation2] ss:$8 sps:$4 sm:$0xff]   ;;  %v3011_v50 = vld [vmem:[#allocation2 + $0xf4] ss:$8 sps:$4 sm:$0xff]  }
 0x1b7   :  { %2807 = vmatpush3.bf16.msra.mxu0 %v2948_v55  ;;  %v726_v55 = vld [vmem:[%s3920_s12 + $0x50] sm:$0xff] }
 0x1b8   :  { %2808 = vmatprep.subr.bf16.mxu0 %v2949_v56  ;;  %v730_v56 = vld [vmem:[%s3920_s12 + $0x70] sm:$0xff] }
 0x1bb   :  { %2809 = vmatpush3.bf16.msra.mxu0 %v2950_v57  ;;  %v727_v57 = vld [vmem:[%s3920_s12 + $0x58] sm:$0xff] }
 0x1bc   :  { %2810 = vmatprep.subr.bf16.mxu0 %v2951_v58  ;;  %v2596_v58 = vcombine.high %v726_v55, %v730_v56 }
 0x1bf   :  { %2811 = vmatpush3.bf16.msra.mxu0 %v2952_v59  ;;  %v731_v59 = vld [vmem:[%s3920_s12 + $0x78] sm:$0xff] }
 0x1c0   :  { %2812 = vmatprep.subr.bf16.mxu0 %v2953_v60  ;;  %v2595_v60 = vcombine.low %v726_v55, %v730_v56  ;;  %v3017_v55 = vld [vmem:[#allocation2 + $0xe4] ss:$8 sps:$4 sm:$0xff]  }
 0x1c1   :  { %v3020_v56 = vld [vmem:[#allocation2 + $0x1e4] ss:$8 sps:$4 sm:$0xff]  }
 0x1c3   :  { %2813 = vmatpush3.bf16.msra.mxu0 %v2954_v61  ;;  %v2597_v61 = vcombine.low %v727_v57, %v731_v59 }
 0x1c4   :  { %2814 = vmatprep.subr.bf16.mxu0 %v2955_v62  ;;  %v2598_v62 = vcombine.high %v727_v57, %v731_v59  ;;  %v3015_v57 = vld [vmem:[#allocation2 + $0xe0] ss:$8 sps:$4 sm:$0xff]   ;;  %v3023_v59 = vld [vmem:[#allocation2 + $0xd4] ss:$8 sps:$4 sm:$0xff]  }
 0x1c7   :  { %2815 = vmatpush3.bf16.msra.mxu0 %v2956_v63 }
 0x1c8   :  { %2816 = vmatprep.subr.bf16.mxu0 %v2957_v9 }
 0x1cb   :  { %2817 = vmatpush3.bf16.msra.mxu0 %v2958_v10 }
 0x1cc   :  { %2818 = vmatprep.subr.bf16.mxu0 %v2959_v11 }
 0x1cf   :  { %2819 = vmatpush3.bf16.msra.mxu0 %v2960_v12 }
 0x1d0   :  { %870 = vmatprep.subr.bf16.mxu0 %v2592_v34  ;;  %v2987_v34 = vld [vmem:[#allocation2 + $0x34] ss:$8 sps:$4 sm:$0xff]  }
 0x272   :  { %v363_v2 = vpop.f32.mrf.mxu0 }
 0x273   :  { %v364_v3 = vadd.f32 %v2541_v1, %v363_v2  ;;  %v706_v1 = vld [vmem:[%s3953_s27] sm:$0x3] }
 0x274   :  { %v2875_v4 = vpop.f32.mrf.mxu0 }
 0x275   :  { %v369_v5 = vmax.f32 %v364_v3, 0.0  ;;  %v718_v4 = vld [vmem:[%s3920_s12 + $0x10] sm:$0xff] }
 0x276   :  { %v366_v6 = vpop.f32.mrf.mxu0 }
 0x277   :  { %v370_v7 = vpack.c.bf16 %v369_v5, %v369_v5  ;;  %v722_v5 = vld [vmem:[%s3920_s12 + $0x30] sm:$0xff]  ;;  %v719_v6 = vld [vmem:[%s3920_s12 + $0x18] sm:$0xff] }
 0x278   :  { %v2876_v8 = vpop.f32.mrf.mxu0  ;;  %v2588_v11 = vcombine.high %v718_v4, %v722_v5  ;;  %v2587_v13 = vcombine.low %v718_v4, %v722_v5  ;;  %v3035_v4 = vld [vmem:[#allocation2 + $0xb4] ss:$8 sps:$4 sm:$0xff]  }
 0x279   :  { %512 = vmatmul.mubr.bf16.vlgmr.msra.gmra.mxu1 %v370_v7  ;;  %v723_v7 = vld [vmem:[%s3920_s12 + $0x38] sm:$0xff] }
 0x27a   :  { %931 = vmatprep.mubr.bf16.mxu1 %v3294_v51  ;;  %912 = vmatpush1.bf16.msra.mxu1 %v2593_v36  ;;  %v2590_v12 = vcombine.high %v719_v6, %v723_v7  ;;  %v2589_v16 = vcombine.low %v719_v6, %v723_v7  ;;  %v2985_v36 = vld [vmem:[#allocation2 + $0x30] ss:$8 sps:$4 sm:$0xff]   ;;  %v3038_v5 = vld [vmem:[#allocation2 + $0x1b4] ss:$8 sps:$4 sm:$0xff]  }
 0x27b   :  { %913 = vmatprep.subr.bf16.mxu1 %v2586_v54  ;;  %v3012_v54 = vld [vmem:[#allocation2 + $0x1f0] ss:$8 sps:$4 sm:$0xff]  }
 0x27c   :  { %v3033_v6 = vld [vmem:[#allocation2 + $0xb0] ss:$8 sps:$4 sm:$0xff]  }
 0x27d   :  { %v3036_v7 = vld [vmem:[#allocation2 + $0x1b0] ss:$8 sps:$4 sm:$0xff]  }
 0x27e   :  { %914 = vmatpush1.bf16.msra.mxu1 %v2585_v53  ;;  %v3009_v53 = vld [vmem:[#allocation2 + $0xf0] ss:$8 sps:$4 sm:$0xff]  }
 0x27f   :  { %993 = vmatprep.subr.bf16.mxu1 %v2598_v62  ;;  %v3024_v62 = vld [vmem:[#allocation2 + $0x1d0] ss:$8 sps:$4 sm:$0xff]  }
 0x339   :  { %v513_v20 = vpop.f32.mrf.mxu1 }
 0x33a   :  { %v514_v21 = vadd.f32 %v513_v20, %v392_v18  ;;  %v2963_v18 = vld [vmem:[#allocation2 + $0x74] ss:$8 sps:$4 sm:$0xff]   ;;  %v2961_v20 = vld [vmem:[#allocation2 + $0x70] ss:$8 sps:$4 sm:$0xff]  }
 0x33b   :  { %v515_v22 = vpop.f32.mrf.mxu1 }
 0x33c   :  { %v516_v23 = vadd.f32 %v515_v22, %v396_v19  ;;  %v520_v24 = vmax.f32 %v514_v21, 0.0  ;;  %v2966_v19 = vld [vmem:[#allocation2 + $0x174] ss:$8 sps:$4 sm:$0xff]   ;;  %v2964_v21 = vld [vmem:[#allocation2 + $0x170] ss:$8 sps:$4 sm:$0xff]  }
 0x33d   :  { %v517_v25 = vpop.f32.mrf.mxu1  ;;  %v2969_v22 = vld [vmem:[#allocation2 + $0x64] ss:$8 sps:$4 sm:$0xff]  }
 0x33e   :  { %v521_v26 = vmax.f32 %v516_v23, 0.0  ;;  %v522_v29 = vpack.c.bf16 %v520_v24, %v520_v24  ;;  %v2972_v23 = vld [vmem:[#allocation2 + $0x164] ss:$8 sps:$4 sm:$0xff]   ;;  %v2967_v24 = vld [vmem:[#allocation2 + $0x60] ss:$8 sps:$4 sm:$0xff]  }
 0x33f   :  { %v518_v27 = vpop.f32.mrf.mxu1  ;;  %v2970_v25 = vld [vmem:[#allocation2 + $0x160] ss:$8 sps:$4 sm:$0xff]  }
 0x340   :  { %v523_v28 = vpack.c.bf16 %v521_v26, %v521_v26  ;;  %v2975_v26 = vld [vmem:[#allocation2 + $0x54] ss:$8 sps:$4 sm:$0xff]  }
 0x341   :  { %v2978_v27 = vld [vmem:[#allocation2 + $0x154] ss:$8 sps:$4 sm:$0xff]  }
 0x342   :  { %691 = vmatprep.mubr.bf16.mxu0 %v523_v28  ;;  %v2973_v28 = vld [vmem:[#allocation2 + $0x50] ss:$8 sps:$4 sm:$0xff]  }
 0x343   :  { %692 = vmatmul.mubr.bf16.vlgmr.msra.gmra.mxu0 %v522_v29  ;;  %v2976_v29 = vld [vmem:[#allocation2 + $0x150] ss:$8 sps:$4 sm:$0xff]  }
 0x344   :  { %890 = vmatprep.mubr.bf16.mxu0 %v3294_v51  ;;  %871 = vmatpush1.bf16.msra.mxu0 %v2591_v33  ;;  %v2982_v33 = vld [vmem:[#allocation2 + $0x140] ss:$8 sps:$4 sm:$0xff]  }
 0x345   :  { %872 = vmatprep.subr.bf16.mxu0 %v2584_v49  ;;  %v3006_v49 = vld [vmem:[#allocation2 + $0x100] ss:$8 sps:$4 sm:$0xff]  }
 0x348   :  { %873 = vmatpush1.bf16.msra.mxu0 %v2583_v52  ;;  %v3014_v52 = vld [vmem:[#allocation2 + $0x1f4] ss:$8 sps:$4 sm:$0xff]  }
 0x349   :  { %952 = vmatprep.subr.bf16.mxu0 %v2596_v58  ;;  %v3018_v58 = vld [vmem:[#allocation2 + $0x1e0] ss:$8 sps:$4 sm:$0xff]  }
 0x403   :  { %v2820_v38 = vpop.f32.mrf.mxu0 }
 0x405   :  { %v2821_v40 = vpop.f32.mrf.mxu0 }
 0x406   :  { %v2822_v41 = vadd.f32 %v2821_v40, %v2820_v38  ;;  %v2993_v38 = vld [vmem:[#allocation2 + $0x24] ss:$8 sps:$4 sm:$0xff]   ;;  %v2991_v40 = vld [vmem:[#allocation2 + $0x20] ss:$8 sps:$4 sm:$0xff]  }
 0x407   :  { %v2823_v42 = vpop.f32.mrf.mxu0 }
 0x408   :  { %v694_v43 = vadd.f32 %v2822_v41, %v2566_v39  ;;  %v2996_v39 = vld [vmem:[#allocation2 + $0x124] ss:$8 sps:$4 sm:$0xff]   ;;  %v2994_v41 = vld [vmem:[#allocation2 + $0x120] ss:$8 sps:$4 sm:$0xff]   ;;  %v2999_v42 = vld [vmem:[#allocation2 + $0x14] ss:$8 sps:$4 sm:$0xff]  }
 0x409   :  { %v2824_v44 = vpop.f32.mrf.mxu0 }
 0x40a   :  { %v707_v45 = vmul.f32 1.442695, %v694_v43  ;;  %700 = vst.msk [vmem:[#allocation5] sm:$0x3] %vm699_vm4, %v694_v43  ;;  %v2997_v44 = vld [vmem:[#allocation2 + $0x10] ss:$8 sps:$4 sm:$0xff]  }
 0x40c   :  { %3221 = vpow2.f32 %v707_v45  ;;  %v3000_v45 = vld [vmem:[#allocation2 + $0x110] ss:$8 sps:$4 sm:$0xff]  }
 0x419   :  { %v3222_v63 = vpop.eup %3221 }
 0x41a   :  { %710 = vrot.lane.b32.xlu0 %v3222_v63, %s3295_s4  ;;  %v3029_v63 = vld [vmem:[#allocation2 + $0xc4] ss:$8 sps:$4 sm:$0xff]  }
 0x41e   :  { %702 = vrot.lane.b32.xlu0 %v694_v43, %s3295_s4 }
 0x48c   :  { %v711_v2 = vpop.permute.xlu0 %710 }
 0x48d   :  { %v713_v3 = vmul.f32 %v711_v2, %v706_v1  ;;  %v3032_v1 = vld [vmem:[#allocation2 + $0x1c4] ss:$8 sps:$4 sm:$0xff]   ;;  %v3027_v2 = vld [vmem:[#allocation2 + $0xc0] ss:$8 sps:$4 sm:$0xff]  }
 0x48f   :  { %v714_v8 = vadd.f32 %v713_v3, %v694_v43  ;;  %v3002_v43 = vld [vmem:[#allocation2 + $0x114] ss:$8 sps:$4 sm:$0xff]   ;;  %v3030_v3 = vld [vmem:[#allocation2 + $0x1c0] ss:$8 sps:$4 sm:$0xff]  }
 0x490   :  { %v703_v9 = vpop.permute.xlu0 %702 }
 0x491   :  { %v715_v10 = vpack.c.bf16 %v714_v8, %v714_v8  ;;  %705 = vst.msk [vmem:[#allocation6] sm:$0x3] %vm699_vm4, %v703_v9  ;;  %v3041_v8 = vld [vmem:[#allocation2 + $0xa4] ss:$8 sps:$4 sm:$0xff]  }
 0x492   :  { %v3044_v9 = vld [vmem:[#allocation2 + $0x1a4] ss:$8 sps:$4 sm:$0xff]  }
 0x493   :  { %2599 = vmatmul.mubr.msk.bf16.vlgmr.msra.gmra.mxu0 %vm854_vm5, %v715_v10  ;;  %2600 = vmatmul.mubr.msk.bf16.vlgmr.msra.gmra.mxu1 %vm854_vm5, %v715_v10 }
 0x494   :  { %953 = vmatpush1.bf16.msra.mxu0 %v2595_v60  ;;  %994 = vmatpush1.bf16.msra.mxu1 %v2597_v61  ;;  %v3026_v60 = vld [vmem:[#allocation2 + $0x1d4] ss:$8 sps:$4 sm:$0xff]   ;;  %v3021_v61 = vld [vmem:[#allocation2 + $0xd0] ss:$8 sps:$4 sm:$0xff]  }
 0x495   :  { %954 = vmatprep.subr.bf16.mxu0 %v2588_v11  ;;  %995 = vmatprep.subr.bf16.mxu1 %v2590_v12  ;;  %v3042_v11 = vld [vmem:[#allocation2 + $0x1a0] ss:$8 sps:$4 sm:$0xff]   ;;  %v3047_v12 = vld [vmem:[#allocation2 + $0x94] ss:$8 sps:$4 sm:$0xff]  }
 0x496   :  { %972 = vmatprep.mubr.bf16.mxu0 %v3294_v51  ;;  %1013 = vmatprep.mubr.bf16.mxu1 %v3294_v51 }
 0x498   :  { %955 = vmatpush1.bf16.msra.mxu0 %v2587_v13  ;;  %996 = vmatpush1.bf16.msra.mxu1 %v2589_v16  ;;  %v3050_v13 = vld [vmem:[#allocation2 + $0x194] ss:$8 sps:$4 sm:$0xff]   ;;  %v3045_v16 = vld [vmem:[#allocation2 + $0x90] ss:$8 sps:$4 sm:$0xff]  }
 0x499   :  { %1818 = vmatprep.subr.bf16.mxu0 %v2963_v18  ;;  %1859 = vmatprep.subr.bf16.mxu1 %v2966_v19  ;;  %v3048_v18 = vld [vmem:[#allocation2 + $0x190] ss:$8 sps:$4 sm:$0xff]   ;;  %v3053_v19 = vld [vmem:[#allocation2 + $0x84] ss:$8 sps:$4 sm:$0xff]  }
 0x49b   :  { %2601 = vmatmul.mubr.msk.bf16.vlgmr.msra.gmra.mxu0 %vm854_vm5, %v715_v10  ;;  %2602 = vmatmul.mubr.msk.bf16.vlgmr.msra.gmra.mxu1 %vm854_vm5, %v715_v10  ;;  %v3039_v10 = vld [vmem:[#allocation2 + $0xa0] ss:$8 sps:$4 sm:$0xff]  }
 0x49c   :  { %1819 = vmatpush1.bf16.msra.mxu0 %v2961_v20  ;;  %1860 = vmatpush1.bf16.msra.mxu1 %v2964_v21  ;;  %v3056_v20 = vld [vmem:[#allocation2 + $0x184] ss:$8 sps:$4 sm:$0xff]   ;;  %v3051_v21 = vld [vmem:[#allocation2 + $0x80] ss:$8 sps:$4 sm:$0xff]  }
 0x49d   :  { %1820 = vmatprep.subr.bf16.mxu0 %v2969_v22  ;;  %1861 = vmatprep.subr.bf16.mxu1 %v2972_v23  ;;  %v3054_v22 = vld [vmem:[#allocation2 + $0x180] ss:$8 sps:$4 sm:$0xff]   ;;  %v3059_v23 = vld [vmem:[#allocation2 + $0x274] ss:$8 sps:$4 sm:$0xff]  }
 0x4a0   :  { %1821 = vmatpush1.bf16.msra.mxu0 %v2967_v24  ;;  %1862 = vmatpush1.bf16.msra.mxu1 %v2970_v25  ;;  %v3062_v24 = vld [vmem:[#allocation2 + $0x374] ss:$8 sps:$4 sm:$0xff]   ;;  %v744_v25 = vsub.s32 2, %v3602_v14 }
 0x4a1   :  { %1822 = vmatprep.subr.bf16.mxu0 %v2975_v26  ;;  %1863 = vmatprep.subr.bf16.mxu1 %v2978_v27  ;;  %v3682_v26 = vld [vmem:[%s3921_s13] sm:$0xff]  ;;  %v748_v27 = vsub.s32 3, %v3602_v14  ;;  %s3296_s13 = smov [#allocation5]  }
 0x4a4   :  { %1823 = vmatpush1.bf16.msra.mxu0 %v2973_v28  ;;  %1864 = vmatpush1.bf16.msra.mxu1 %v2976_v29  ;;  %v737_v28 = vrot.slane %v3682_v26, %v3605_v15  ;;  %v745_v29 = vrot.slane %v3682_v26, %v744_v25  ;;  %v3083_v25 = vld [vmem:[#allocation2 + $0x234] ss:$8 sps:$4 sm:$0xff]  }
 0x4a5   :  { %1824 = vmatprep.subr.bf16.mxu0 %v2981_v30  ;;  %1865 = vmatprep.subr.bf16.mxu1 %v2984_v31  ;;  %v741_v30 = vrot.slane %v3682_v26, %v3611_v17  ;;  %v749_v31 = vrot.slane %v3682_v26, %v748_v27  ;;  %v3086_v27 = vld [vmem:[#allocation2 + $0x334] ss:$8 sps:$4 sm:$0xff]  }
 0x4a8   :  { %1825 = vmatpush1.bf16.msra.mxu0 %v2979_v32  ;;  %1866 = vmatpush1.bf16.msra.mxu1 %v2982_v33 }
 0x4a9   :  { %1826 = vmatprep.subr.bf16.mxu0 %v2987_v34  ;;  %1867 = vmatprep.subr.bf16.mxu1 %v2990_v35 }
 0x4ac   :  { %1827 = vmatpush1.bf16.msra.mxu0 %v2985_v36  ;;  %1868 = vmatpush1.bf16.msra.mxu1 %v2988_v37 }
 0x4ad   :  { %1828 = vmatprep.subr.bf16.mxu0 %v2993_v38  ;;  %1869 = vmatprep.subr.bf16.mxu1 %v2996_v39 }
 0x4b0   :  { %1829 = vmatpush1.bf16.msra.mxu0 %v2991_v40  ;;  %1870 = vmatpush1.bf16.msra.mxu1 %v2994_v41  ;;  %v756_v40 = vsub.s32 5, %v3602_v14  ;;  %v764_v41 = vsub.s32 7, %v3602_v14 }
 0x4b1   :  { %1830 = vmatprep.subr.bf16.mxu0 %v2999_v42  ;;  %1871 = vmatprep.subr.bf16.mxu1 %v3002_v43 }
 0x4b4   :  { %1831 = vmatpush1.bf16.msra.mxu0 %v2997_v44  ;;  %1872 = vmatpush1.bf16.msra.mxu1 %v3000_v45 }
 0x4b5   :  { %1832 = vmatprep.subr.bf16.mxu0 %v3005_v46  ;;  %1873 = vmatprep.subr.bf16.mxu1 %v3008_v47 }
 0x4b8   :  { %1833 = vmatpush1.bf16.msra.mxu0 %v3003_v48  ;;  %1874 = vmatpush1.bf16.msra.mxu1 %v3006_v49 }
 0x4b9   :  { %1834 = vmatprep.subr.bf16.mxu0 %v3011_v50  ;;  %1875 = vmatprep.subr.bf16.mxu1 %v3014_v52 }
 0x4bc   :  { %1835 = vmatpush2.bf16.msra.mxu0 %v3009_v53  ;;  %1876 = vmatpush2.bf16.msra.mxu1 %v3012_v54  ;;  %v3057_v53 = vld [vmem:[#allocation2 + $0x270] ss:$8 sps:$4 sm:$0xff]  }
 0x4bd   :  { %1836 = vmatprep.subr.bf16.mxu0 %v3017_v55  ;;  %1877 = vmatprep.subr.bf16.mxu1 %v3020_v56  ;;  %v3060_v54 = vld [vmem:[#allocation2 + $0x370] ss:$8 sps:$4 sm:$0xff]   ;;  %v757_v55 = vrot.slane %v3682_v26, %v756_v40  ;;  %v765_v56 = vrot.slane %v3682_v26, %v764_v41  ;;  %v3099_v40 = vld [vmem:[#allocation2 + $0x200] ss:$8 sps:$4 sm:$0xff]  }
 0x4be   :  { %v3102_v41 = vld [vmem:[#allocation2 + $0x300] ss:$8 sps:$4 sm:$0xff]  }
 0x4c0   :  { %1837 = vmatpush2.bf16.msra.mxu0 %v3015_v57  ;;  %1878 = vmatpush2.bf16.msra.mxu1 %v3018_v58 }
 0x4c1   :  { %1838 = vmatprep.subr.bf16.mxu0 %v3023_v59  ;;  %1879 = vmatprep.subr.bf16.mxu1 %v3026_v60 }
 0x4c4   :  { %1839 = vmatpush2.bf16.msra.mxu0 %v3021_v61  ;;  %1880 = vmatpush2.bf16.msra.mxu1 %v3024_v62  ;;  %v3065_v61 = vld [vmem:[#allocation2 + $0x264] ss:$8 sps:$4 sm:$0xff]  }
 0x4c5   :  { %1840 = vmatprep.subr.bf16.mxu0 %v3029_v63  ;;  %1881 = vmatprep.subr.bf16.mxu1 %v3032_v1  ;;  %v3068_v62 = vld [vmem:[#allocation2 + $0x364] ss:$8 sps:$4 sm:$0xff]  }
 0x4c8   :  { %1841 = vmatpush2.bf16.msra.mxu0 %v3027_v2  ;;  %1882 = vmatpush2.bf16.msra.mxu1 %v3030_v3 }
 0x4c9   :  { %1842 = vmatprep.subr.bf16.mxu0 %v3035_v4  ;;  %1883 = vmatprep.subr.bf16.mxu1 %v3038_v5  ;;  %v3063_v4 = vld [vmem:[#allocation2 + $0x260] ss:$8 sps:$4 sm:$0xff]  }
 0x4ca   :  { %v3066_v5 = vld [vmem:[#allocation2 + $0x360] ss:$8 sps:$4 sm:$0xff]  }
 0x4cc   :  { %1843 = vmatpush2.bf16.msra.mxu0 %v3033_v6  ;;  %1884 = vmatpush2.bf16.msra.mxu1 %v3036_v7 }
 0x4cd   :  { %1844 = vmatprep.subr.bf16.mxu0 %v3041_v8  ;;  %1885 = vmatprep.subr.bf16.mxu1 %v3044_v9  ;;  %v3071_v8 = vld [vmem:[#allocation2 + $0x254] ss:$8 sps:$4 sm:$0xff]  }
 0x4ce   :  { %v3074_v9 = vld [vmem:[#allocation2 + $0x354] ss:$8 sps:$4 sm:$0xff]  }
 0x4d0   :  { %1845 = vmatpush2.bf16.msra.mxu0 %v3039_v10  ;;  %1886 = vmatpush2.bf16.msra.mxu1 %v3042_v11 }
 0x4d1   :  { %1846 = vmatprep.subr.bf16.mxu0 %v3047_v12  ;;  %1887 = vmatprep.subr.bf16.mxu1 %v3050_v13 }
 0x4d4   :  { %1847 = vmatpush2.bf16.msra.mxu0 %v3045_v16  ;;  %1888 = vmatpush2.bf16.msra.mxu1 %v3048_v18 }
 0x4d5   :  { %1848 = vmatprep.subr.bf16.mxu0 %v3053_v19  ;;  %1889 = vmatprep.subr.bf16.mxu1 %v3056_v20  ;;  %v3069_v19 = vld [vmem:[#allocation2 + $0x250] ss:$8 sps:$4 sm:$0xff]  }
 0x4d6   :  { %v3072_v20 = vld [vmem:[#allocation2 + $0x350] ss:$8 sps:$4 sm:$0xff]  }
 0x4d8   :  { %1849 = vmatpush2.bf16.msra.mxu0 %v3051_v21  ;;  %1890 = vmatpush2.bf16.msra.mxu1 %v3054_v22  ;;  %v3077_v21 = vld [vmem:[#allocation2 + $0x244] ss:$8 sps:$4 sm:$0xff]  }
 0x4d9   :  { %1900 = vmatprep.subr.bf16.mxu0 %v3059_v23  ;;  %1941 = vmatprep.subr.bf16.mxu1 %v3062_v24  ;;  %v3080_v22 = vld [vmem:[#allocation2 + $0x344] ss:$8 sps:$4 sm:$0xff]   ;;  %v3075_v23 = vld [vmem:[#allocation2 + $0x240] ss:$8 sps:$4 sm:$0xff]  }
 0x4da   :  { %v3078_v24 = vld [vmem:[#allocation2 + $0x340] ss:$8 sps:$4 sm:$0xff]  }
 0x553   :  { %v892_v32 = vpop.f32.mrf.mxu0  ;;  %v933_v33 = vpop.f32.mrf.mxu1 }
 0x554   :  { %v893_v34 = vadd.f32 %v892_v32, %v737_v28  ;;  %v934_v35 = vadd.f32 %v933_v33, %v745_v29  ;;  %v3081_v28 = vld [vmem:[#allocation2 + $0x230] ss:$8 sps:$4 sm:$0xff]   ;;  %v3087_v32 = vld [vmem:[#allocation2 + $0x220] ss:$8 sps:$4 sm:$0xff]  }
 0x555   :  { %v894_v36 = vpop.f32.mrf.mxu0  ;;  %v935_v37 = vpop.f32.mrf.mxu1  ;;  %v3084_v29 = vld [vmem:[#allocation2 + $0x330] ss:$8 sps:$4 sm:$0xff]   ;;  %v3090_v33 = vld [vmem:[#allocation2 + $0x320] ss:$8 sps:$4 sm:$0xff]  }
 0x556   :  { %v895_v38 = vadd.f32 %v894_v36, %v741_v30  ;;  %v936_v39 = vadd.f32 %v935_v37, %v749_v31  ;;  %v1022_v42 = vmax.f32 %v893_v34, 0.0  ;;  %v1024_v43 = vmax.f32 %v934_v35, 0.0  ;;  %v3089_v30 = vld [vmem:[#allocation2 + $0x224] ss:$8 sps:$4 sm:$0xff]   ;;  %v3095_v34 = vld [vmem:[#allocation2 + $0x214] ss:$8 sps:$4 sm:$0xff]  }
 0x557   :  { %v896_v44 = vpop.f32.mrf.mxu0  ;;  %v937_v45 = vpop.f32.mrf.mxu1  ;;  %v3092_v31 = vld [vmem:[#allocation2 + $0x324] ss:$8 sps:$4 sm:$0xff]   ;;  %v3098_v35 = vld [vmem:[#allocation2 + $0x314] ss:$8 sps:$4 sm:$0xff]   ;;  %v3093_v36 = vld [vmem:[#allocation2 + $0x210] ss:$8 sps:$4 sm:$0xff]  }
 0x558   :  { %v1023_v46 = vmax.f32 %v895_v38, 0.0  ;;  %v1025_v47 = vmax.f32 %v936_v39, 0.0  ;;  %v1030_v57 = vpack.c.bf16 %v1022_v42, %v1022_v42  ;;  %v1032_v58 = vpack.c.bf16 %v1024_v43, %v1024_v43  ;;  %v3096_v37 = vld [vmem:[#allocation2 + $0x310] ss:$8 sps:$4 sm:$0xff]   ;;  %v3101_v38 = vld [vmem:[#allocation2 + $0x204] ss:$8 sps:$4 sm:$0xff]  }
 0x559   :  { %v897_v48 = vpop.f32.mrf.mxu0  ;;  %v938_v49 = vpop.f32.mrf.mxu1  ;;  %v3104_v39 = vld [vmem:[#allocation2 + $0x304] ss:$8 sps:$4 sm:$0xff]   ;;  %v3107_v42 = vld [vmem:[#allocation2 + $0x2f4] ss:$8 sps:$4 sm:$0xff]   ;;  %v3105_v44 = vld [vmem:[#allocation2 + $0x2f0] ss:$8 sps:$4 sm:$0xff]  }
 0x55a   :  { %v1031_v50 = vpack.c.bf16 %v1023_v46, %v1023_v46  ;;  %v1033_v52 = vpack.c.bf16 %v1025_v47, %v1025_v47  ;;  %v3110_v43 = vld [vmem:[#allocation2 + $0x3f4] ss:$8 sps:$4 sm:$0xff]   ;;  %v3108_v45 = vld [vmem:[#allocation2 + $0x3f0] ss:$8 sps:$4 sm:$0xff]   ;;  %v3113_v46 = vld [vmem:[#allocation2 + $0x2e4] ss:$8 sps:$4 sm:$0xff]  }
 0x55b   :  { %v3695_v59 = vpop.f32.mrf.mxu0  ;;  %v3697_v60 = vpop.f32.mrf.mxu1  ;;  %v3116_v47 = vld [vmem:[#allocation2 + $0x3e4] ss:$8 sps:$4 sm:$0xff]   ;;  %v3111_v48 = vld [vmem:[#allocation2 + $0x2e0] ss:$8 sps:$4 sm:$0xff]  }
 0x55c   :  { %1850 = vmatprep.mubr.bf16.mxu0 %v1031_v50  ;;  %1891 = vmatprep.mubr.bf16.mxu1 %v1033_v52  ;;  %v3114_v49 = vld [vmem:[#allocation2 + $0x3e0] ss:$8 sps:$4 sm:$0xff]   ;;  %v3119_v50 = vld [vmem:[#allocation2 + $0x2d4] ss:$8 sps:$4 sm:$0xff]  }
 0x55d   :  { %v976_v63 = vpop.f32.mrf.mxu0  ;;  %v1017_v1 = vpop.f32.mrf.mxu1  ;;  %1851 = vmatmul.mubr.bf16.vlgmr.msra.gmra.mxu0 %v1030_v57  ;;  %1892 = vmatmul.mubr.bf16.vlgmr.msra.gmra.mxu1 %v1032_v58  ;;  %v3122_v52 = vld [vmem:[#allocation2 + $0x3d4] ss:$8 sps:$4 sm:$0xff]   ;;  %v3123_v57 = vld [vmem:[#allocation2 + $0x2c0] ss:$8 sps:$4 sm:$0xff]  }
 0x55e   :  { %v977_v2 = vadd.f32 %v976_v63, %v757_v55  ;;  %v1018_v3 = vadd.f32 %v1017_v1, %v765_v56  ;;  %1901 = vmatpush1.bf16.msra.mxu0 %v3057_v53  ;;  %1942 = vmatpush1.bf16.msra.mxu1 %v3060_v54  ;;  %v3117_v53 = vld [vmem:[#allocation2 + $0x2d0] ss:$8 sps:$4 sm:$0xff]   ;;  %v3125_v55 = vld [vmem:[#allocation2 + $0x2c4] ss:$8 sps:$4 sm:$0xff]   ;;  %v3126_v58 = vld [vmem:[#allocation2 + $0x3c0] ss:$8 sps:$4 sm:$0xff]  }
 0x55f   :  { %v978_v6 = vpop.f32.mrf.mxu0  ;;  %v1019_v7 = vpop.f32.mrf.mxu1  ;;  %1902 = vmatprep.subr.bf16.mxu0 %v3065_v61  ;;  %1943 = vmatprep.subr.bf16.mxu1 %v3068_v62  ;;  %v3120_v54 = vld [vmem:[#allocation2 + $0x3d0] ss:$8 sps:$4 sm:$0xff]   ;;  %v3128_v56 = vld [vmem:[#allocation2 + $0x3c4] ss:$8 sps:$4 sm:$0xff]   ;;  %v3131_v61 = vld [vmem:[#allocation2 + $0x2b4] ss:$8 sps:$4 sm:$0xff]  }
 0x560   :  { %v1027_v10 = vmax.f32 %v977_v2, 0.0  ;;  %v1029_v11 = vmax.f32 %v1018_v3, 0.0  ;;  %v3134_v62 = vld [vmem:[#allocation2 + $0x3b4] ss:$8 sps:$4 sm:$0xff]   ;;  %v3129_v63 = vld [vmem:[#allocation2 + $0x2b0] ss:$8 sps:$4 sm:$0xff]  }
 0x561   :  { %v979_v12 = vpop.f32.mrf.mxu0  ;;  %v1020_v13 = vpop.f32.mrf.mxu1  ;;  %v3132_v1 = vld [vmem:[#allocation2 + $0x3b0] ss:$8 sps:$4 sm:$0xff]   ;;  %v752_v2 = vsub.s32 4, %v3602_v14  ;;  %v760_v3 = vsub.s32 6, %v3602_v14  ;;  %v3135_v6 = vld [vmem:[#allocation2 + $0x2a0] ss:$8 sps:$4 sm:$0xff]  }
 0x562   :  { %v1035_v16 = vpack.c.bf16 %v1027_v10, %v1027_v10  ;;  %v1037_v18 = vpack.c.bf16 %v1029_v11, %v1029_v11  ;;  %1903 = vmatpush1.bf16.msra.mxu0 %v3063_v4  ;;  %1944 = vmatpush1.bf16.msra.mxu1 %v3066_v5  ;;  %v3137_v4 = vld [vmem:[#allocation2 + $0x2a4] ss:$8 sps:$4 sm:$0xff]   ;;  %v3138_v7 = vld [vmem:[#allocation2 + $0x3a0] ss:$8 sps:$4 sm:$0xff]   ;;  %v3143_v10 = vld [vmem:[#allocation2 + $0x294] ss:$8 sps:$4 sm:$0xff]  }
 0x563   :  { %1904 = vmatprep.subr.bf16.mxu0 %v3071_v8  ;;  %1945 = vmatprep.subr.bf16.mxu1 %v3074_v9  ;;  %v3140_v5 = vld [vmem:[#allocation2 + $0x3a4] ss:$8 sps:$4 sm:$0xff]   ;;  %v753_v8 = vrot.slane %v3682_v26, %v752_v2  ;;  %v761_v9 = vrot.slane %v3682_v26, %v760_v3  ;;  %v3146_v11 = vld [vmem:[#allocation2 + $0x394] ss:$8 sps:$4 sm:$0xff]   ;;  %v3141_v12 = vld [vmem:[#allocation2 + $0x290] ss:$8 sps:$4 sm:$0xff]  }
 0x564   :  { %1932 = vmatprep.mubr.bf16.mxu0 %v1035_v16  ;;  %1973 = vmatprep.mubr.bf16.mxu1 %v1037_v18  ;;  %v3144_v14 = vld [vmem:[#allocation2 + $0x390] ss:$8 sps:$4 sm:$0xff]   ;;  %v3149_v18 = vld [vmem:[#allocation2 + $0x284] ss:$8 sps:$4 sm:$0xff]   ;;  %v3150_v26 = vld [vmem:[#allocation2 + $0x380] ss:$8 sps:$4 sm:$0xff]  }
 0x565   :  { %v975_v13 = vadd.f32 %v3695_v59, %v753_v8  ;;  %v1016_v16 = vadd.f32 %v3697_v60, %v761_v9  ;;  %v3153_v59 = vld [vmem:[%s3924_s16 + $0x70] ss:$8 sps:$4 sm:$0xff]   ;;  %v3155_v60 = vld [vmem:[%s3924_s16 + $0x74] ss:$8 sps:$4 sm:$0xff]   ;;  %v3207_v2 = vld [vmem:[%s3926_s18 + $0x8] sm:$0xff]  }
 0x566   :  { %1905 = vmatpush1.bf16.msra.mxu0 %v3069_v19  ;;  %1946 = vmatpush1.bf16.msra.mxu1 %v3072_v20  ;;  %v3152_v19 = vld [vmem:[#allocation2 + $0x384] ss:$8 sps:$4 sm:$0xff]   ;;  %v3147_v20 = vld [vmem:[#allocation2 + $0x280] ss:$8 sps:$4 sm:$0xff]  }
 0x567   :  { %1906 = vmatprep.subr.bf16.mxu0 %v3077_v21  ;;  %1947 = vmatprep.subr.bf16.mxu1 %v3080_v22  ;;  %v1026_v21 = vmax.f32 %v975_v13, 0.0  ;;  %v1028_v22 = vmax.f32 %v1016_v16, 0.0  ;;  %v3208_v3 = vld [vmem:[%s3926_s18] sm:$0xff]  }
 0x568   :  { %v1166_v13 = vld [vmem:[%s3923_s15] sm:$0x3]  ;;  %s2505_s15 = sshll.u32 %s3296_s13, 4  ;;  %s2506_s15 = int_to_ptr.vmem [resolvable:$true] %s2505_s15 }
 0x569   :  { %v1171_v16 = vrot.slane %v1166_v13, %v3605_v15  ;;  %p3248_p6 = scmp.lt.s32.totalorder %s2506_s15, %s2506_s15 }
 0x56a   :  { %1907 = vmatpush1.bf16.msra.mxu0 %v3075_v23  ;;  %1948 = vmatpush1.bf16.msra.mxu1 %v3078_v24  ;;  %v1034_v23 = vpack.c.bf16 %v1026_v21, %v1026_v21  ;;  %v1036_v24 = vpack.c.bf16 %v1028_v22, %v1028_v22 }
 0x56b   :  { %1908 = vmatprep.subr.bf16.mxu0 %v3083_v25  ;;  %1949 = vmatprep.subr.bf16.mxu1 %v3086_v27  ;;  %v3158_v25 = vld [vmem:[%s3924_s16 + $0x64] ss:$8 sps:$4 sm:$0xff]   ;;  %v3156_v27 = vld [vmem:[%s3924_s16 + $0x60] ss:$8 sps:$4 sm:$0xff]  }
 0x56e   :  { %1909 = vmatpush1.bf16.msra.mxu0 %v3081_v28  ;;  %1950 = vmatpush1.bf16.msra.mxu1 %v3084_v29  ;;  %v3161_v28 = vld [vmem:[%s3924_s16 + $0x54] ss:$8 sps:$4 sm:$0xff]   ;;  %v3159_v29 = vld [vmem:[%s3924_s16 + $0x50] ss:$8 sps:$4 sm:$0xff]  }
 0x56f   :  { %1910 = vmatprep.subr.bf16.mxu0 %v3089_v30  ;;  %1951 = vmatprep.subr.bf16.mxu1 %v3092_v31  ;;  %v3164_v30 = vld [vmem:[%s3924_s16 + $0x44] ss:$8 sps:$4 sm:$0xff]   ;;  %v3162_v31 = vld [vmem:[%s3924_s16 + $0x40] ss:$8 sps:$4 sm:$0xff]  }
 0x572   :  { %1911 = vmatpush1.bf16.msra.mxu0 %v3087_v32  ;;  %1952 = vmatpush1.bf16.msra.mxu1 %v3090_v33  ;;  %v3167_v32 = vld [vmem:[%s3924_s16 + $0x34] ss:$8 sps:$4 sm:$0xff]   ;;  %v3165_v33 = vld [vmem:[%s3924_s16 + $0x30] ss:$8 sps:$4 sm:$0xff]  }
 0x573   :  { %1912 = vmatprep.subr.bf16.mxu0 %v3095_v34  ;;  %1953 = vmatprep.subr.bf16.mxu1 %v3098_v35  ;;  %v3170_v34 = vld [vmem:[%s3924_s16 + $0x24] ss:$8 sps:$4 sm:$0xff]   ;;  %v3168_v35 = vld [vmem:[%s3924_s16 + $0x20] ss:$8 sps:$4 sm:$0xff]  }
 0x576   :  { %1913 = vmatpush1.bf16.msra.mxu0 %v3093_v36  ;;  %1954 = vmatpush1.bf16.msra.mxu1 %v3096_v37  ;;  %v3173_v36 = vld [vmem:[%s3924_s16 + $0x14] ss:$8 sps:$4 sm:$0xff]   ;;  %v3171_v37 = vld [vmem:[%s3924_s16 + $0x10] ss:$8 sps:$4 sm:$0xff]  }
 0x577   :  { %1914 = vmatprep.subr.bf16.mxu0 %v3101_v38  ;;  %1955 = vmatprep.subr.bf16.mxu1 %v3104_v39  ;;  %v3176_v38 = vld [vmem:[%s3924_s16 + $0x4] ss:$8 sps:$4 sm:$0xff]   ;;  %v3174_v39 = vld [vmem:[%s3924_s16] ss:$8 sps:$4 sm:$0xff]  }
 0x57a   :  { %1915 = vmatpush1.bf16.msra.mxu0 %v3099_v40  ;;  %1956 = vmatpush1.bf16.msra.mxu1 %v3102_v41  ;;  %v3179_v40 = vld [vmem:[%s3924_s16 + $0xf4] ss:$8 sps:$4 sm:$0xff]   ;;  %v3177_v41 = vld [vmem:[%s3924_s16 + $0xf0] ss:$8 sps:$4 sm:$0xff]  }
 0x57b   :  { %1916 = vmatprep.subr.bf16.mxu0 %v3107_v42  ;;  %1957 = vmatprep.subr.bf16.mxu1 %v3110_v43  ;;  %v3182_v42 = vld [vmem:[%s3924_s16 + $0xe4] ss:$8 sps:$4 sm:$0xff]   ;;  %v3180_v43 = vld [vmem:[%s3924_s16 + $0xe0] ss:$8 sps:$4 sm:$0xff]  }
 0x57e   :  { %1917 = vmatpush2.bf16.msra.mxu0 %v3105_v44  ;;  %1958 = vmatpush2.bf16.msra.mxu1 %v3108_v45  ;;  %v3185_v44 = vld [vmem:[%s3924_s16 + $0xd4] ss:$8 sps:$4 sm:$0xff]   ;;  %v3183_v45 = vld [vmem:[%s3924_s16 + $0xd0] ss:$8 sps:$4 sm:$0xff]  }
 0x57f   :  { %1918 = vmatprep.subr.bf16.mxu0 %v3113_v46  ;;  %1959 = vmatprep.subr.bf16.mxu1 %v3116_v47  ;;  %v3188_v46 = vld [vmem:[%s3924_s16 + $0xc4] ss:$8 sps:$4 sm:$0xff]   ;;  %v3186_v47 = vld [vmem:[%s3924_s16 + $0xc0] ss:$8 sps:$4 sm:$0xff]  }
 0x582   :  { %1919 = vmatpush2.bf16.msra.mxu0 %v3111_v48  ;;  %1960 = vmatpush2.bf16.msra.mxu1 %v3114_v49  ;;  %v3191_v48 = vld [vmem:[%s3924_s16 + $0xb4] ss:$8 sps:$4 sm:$0xff]   ;;  %v3189_v49 = vld [vmem:[%s3924_s16 + $0xb0] ss:$8 sps:$4 sm:$0xff]  }
 0x583   :  { %1920 = vmatprep.subr.bf16.mxu0 %v3119_v50  ;;  %1961 = vmatprep.subr.bf16.mxu1 %v3122_v52  ;;  %v3194_v50 = vld [vmem:[%s3924_s16 + $0xa4] ss:$8 sps:$4 sm:$0xff]   ;;  %v3192_v52 = vld [vmem:[%s3924_s16 + $0xa0] ss:$8 sps:$4 sm:$0xff]  }
 0x586   :  { %1921 = vmatpush2.bf16.msra.mxu0 %v3117_v53  ;;  %1962 = vmatpush2.bf16.msra.mxu1 %v3120_v54  ;;  %v3197_v53 = vld [vmem:[%s3924_s16 + $0x94] ss:$8 sps:$4 sm:$0xff]   ;;  %v3195_v54 = vld [vmem:[%s3924_s16 + $0x90] ss:$8 sps:$4 sm:$0xff]  }
 0x587   :  { %1922 = vmatprep.subr.bf16.mxu0 %v3125_v55  ;;  %1963 = vmatprep.subr.bf16.mxu1 %v3128_v56  ;;  %v3200_v55 = vld [vmem:[%s3924_s16 + $0x84] ss:$8 sps:$4 sm:$0xff]   ;;  %v3198_v56 = vld [vmem:[%s3924_s16 + $0x80] ss:$8 sps:$4 sm:$0xff]  }
 0x58a   :  { %1923 = vmatpush2.bf16.msra.mxu0 %v3123_v57  ;;  %1964 = vmatpush2.bf16.msra.mxu1 %v3126_v58  ;;  %v3201_v57 = vld [vmem:[%s3926_s18 + $0x38] sm:$0xff]   ;;  %v3202_v58 = vld [vmem:[%s3926_s18 + $0x30] sm:$0xff]  }
 0x58b   :  { %1924 = vmatprep.subr.bf16.mxu0 %v3131_v61  ;;  %1965 = vmatprep.subr.bf16.mxu1 %v3134_v62  ;;  %v3203_v61 = vld [vmem:[%s3926_s18 + $0x28] sm:$0xff]   ;;  %v3204_v62 = vld [vmem:[%s3926_s18 + $0x20] sm:$0xff]  }
 0x58e   :  { %1925 = vmatpush2.bf16.msra.mxu0 %v3129_v63  ;;  %1966 = vmatpush2.bf16.msra.mxu1 %v3132_v1  ;;  %v3205_v63 = vld [vmem:[%s3926_s18 + $0x18] sm:$0xff]   ;;  %v3206_v1 = vld [vmem:[%s3926_s18 + $0x10] sm:$0xff]  }
 0x58f   :  { %1926 = vmatprep.subr.bf16.mxu0 %v3137_v4  ;;  %1967 = vmatprep.subr.bf16.mxu1 %v3140_v5  ;;  %v3209_v4 = vld [vmem:[%s3926_s18 + $0x58] sm:$0xff]   ;;  %v3210_v5 = vld [vmem:[%s3926_s18 + $0x50] sm:$0xff]  }
 0x592   :  { %1927 = vmatpush2.bf16.msra.mxu0 %v3135_v6  ;;  %1968 = vmatpush2.bf16.msra.mxu1 %v3138_v7 }
 0x593   :  { %1928 = vmatprep.subr.bf16.mxu0 %v3143_v10  ;;  %1969 = vmatprep.subr.bf16.mxu1 %v3146_v11 }
 0x596   :  { %1929 = vmatpush2.bf16.msra.mxu0 %v3141_v12  ;;  %1970 = vmatpush2.bf16.msra.mxu1 %v3144_v14 }
 0x597   :  { %1930 = vmatprep.subr.bf16.mxu0 %v3149_v18  ;;  %1971 = vmatprep.subr.bf16.mxu1 %v3152_v19  ;;  %v1175_v18 = vrot.slane %v1166_v13, %v3611_v17 }
 0x59a   :  { %1931 = vmatpush2.bf16.msra.mxu0 %v3147_v20  ;;  %1972 = vmatpush2.bf16.msra.mxu1 %v3150_v26 }
 0x59b   :  { %2342 = vmatprep.subr.bf16.mxu1 %v3294_v51  ;;  %2190 = vmatprep.subr.bf16.mxu0 %v3155_v60 }
 0x59d   :  { %1933 = vmatmul.mubr.bf16.vlgmr.msra.gmra.mxu0 %v1034_v23  ;;  %1974 = vmatmul.mubr.bf16.vlgmr.msra.gmra.mxu1 %v1036_v24 }
 0x59e   :  { %2191 = vmatpush1.bf16.msra.mxu0 %v3153_v59  ;;  %2343 = vmatpush1.bf16.msra.mxu1 %v3201_v57  ;;  %v3220_v57 = vld [vmem:[%s3928_s20] sm:$0xff]  }
 0x59f   :  { %2192 = vmatprep.subr.bf16.mxu0 %v3158_v25  ;;  %2344 = vmatprep.subr.bf16.mxu1 %v3294_v51 }
 0x5a2   :  { %2193 = vmatpush1.bf16.msra.mxu0 %v3156_v27  ;;  %2345 = vmatpush1.bf16.msra.mxu1 %v3202_v58  ;;  %v2763_v58 = vld [vmem:[%s3927_s19] ss:$0 sm:$0xff] }
 0x5a3   :  { %2194 = vmatprep.subr.bf16.mxu0 %v3161_v28  ;;  %2346 = vmatprep.subr.bf16.mxu1 %v3294_v51 }
 0x5a6   :  { %2195 = vmatpush1.bf16.msra.mxu0 %v3159_v29  ;;  %2347 = vmatpush1.bf16.msra.mxu1 %v3203_v61 }
 0x5a7   :  { %2196 = vmatprep.subr.bf16.mxu0 %v3164_v30  ;;  %2348 = vmatprep.subr.bf16.mxu1 %v3294_v51 }
 0x5aa   :  { %2197 = vmatpush1.bf16.msra.mxu0 %v3162_v31  ;;  %2349 = vmatpush1.bf16.msra.mxu1 %v3204_v62 }
 0x5ab   :  { %2198 = vmatprep.subr.bf16.mxu0 %v3167_v32  ;;  %2350 = vmatprep.subr.bf16.mxu1 %v3294_v51 }
 0x5ae   :  { %2199 = vmatpush1.bf16.msra.mxu0 %v3165_v33  ;;  %2351 = vmatpush1.bf16.msra.mxu1 %v3205_v63 }
 0x5af   :  { %2200 = vmatprep.subr.bf16.mxu0 %v3170_v34  ;;  %2352 = vmatprep.subr.bf16.mxu1 %v3294_v51 }
 0x5b2   :  { %2201 = vmatpush1.bf16.msra.mxu0 %v3168_v35  ;;  %2353 = vmatpush1.bf16.msra.mxu1 %v3206_v1 }
 0x5b3   :  { %2202 = vmatprep.subr.bf16.mxu0 %v3173_v36  ;;  %2354 = vmatprep.subr.bf16.mxu1 %v3294_v51 }
 0x5b6   :  { %2203 = vmatpush1.bf16.msra.mxu0 %v3171_v37  ;;  %2355 = vmatpush1.bf16.msra.mxu1 %v3207_v2  ;;  %v3211_v37 = vld [vmem:[%s3926_s18 + $0x48] sm:$0xff]  }
 0x5b7   :  { %2204 = vmatprep.subr.bf16.mxu0 %v3176_v38  ;;  %2356 = vmatprep.subr.bf16.mxu1 %v3294_v51  ;;  %v3212_v38 = vld [vmem:[%s3926_s18 + $0x40] sm:$0xff]  }
 0x5ba   :  { %2205 = vmatpush1.bf16.msra.mxu0 %v3174_v39  ;;  %2357 = vmatpush1.bf16.msra.mxu1 %v3208_v3  ;;  %v2018_v39 = vld [vmem:[%s3925_s17] sm:$0x3] }
 0x5bb   :  { %2206 = vmatprep.subr.bf16.mxu0 %v3179_v40  ;;  %2366 = vmatprep.subr.bf16.mxu1 %v3294_v51  ;;  %v2023_v40 = vrot.slane %v2018_v39, %v3605_v15  ;;  %v3214_v15 = vld [vmem:[%s3928_s20 + $0x30] sm:$0xff]  }
 0x5be   :  { %2207 = vmatpush2.bf16.msra.mxu0 %v3177_v41  ;;  %2367 = vmatpush2.bf16.msra.mxu1 %v3209_v4  ;;  %v2027_v41 = vrot.slane %v2018_v39, %v3611_v17  ;;  %v3215_v17 = vld [vmem:[%s3928_s20 + $0x28] sm:$0xff]  }
 0x5bf   :  { %2208 = vmatprep.subr.bf16.mxu0 %v3182_v42  ;;  %2368 = vmatprep.subr.bf16.mxu1 %v3294_v51 }
 0x5c2   :  { %2209 = vmatpush2.bf16.msra.mxu0 %v3180_v43  ;;  %2369 = vmatpush2.bf16.msra.mxu1 %v3210_v5 }
 0x5c3   :  { %2210 = vmatprep.subr.bf16.mxu0 %v3185_v44  ;;  %2370 = vmatprep.subr.bf16.mxu1 %v3294_v51 }
 0x5c6   :  { %2211 = vmatpush2.bf16.msra.mxu0 %v3183_v45  ;;  %2371 = vmatpush2.bf16.msra.mxu1 %v3211_v37 }
 0x5c7   :  { %2212 = vmatprep.subr.bf16.mxu0 %v3188_v46  ;;  %2372 = vmatprep.subr.bf16.mxu1 %v3294_v51 }
 0x5ca   :  { %2213 = vmatpush2.bf16.msra.mxu0 %v3186_v47  ;;  %2373 = vmatpush2.bf16.msra.mxu1 %v3212_v38 }
 0x5cb   :  { %2214 = vmatprep.subr.bf16.mxu0 %v3191_v48  ;;  %2877 = vmatprep.subr.bf16.mxu1 %v3292_v0 }
 0x5ce   :  { %2215 = vmatpush2.bf16.msra.mxu0 %v3189_v49 }
 0x5cf   :  { %2216 = vmatprep.subr.bf16.mxu0 %v3194_v50  ;;  %v3213_v50 = vld [vmem:[%s3928_s20 + $0x38] sm:$0xff]  }
 0x5d2   :  { %2217 = vmatpush2.bf16.msra.mxu0 %v3192_v52 }
 0x5d3   :  { %2218 = vmatprep.subr.bf16.mxu0 %v3197_v53  ;;  %v3216_v53 = vld [vmem:[%s3928_s20 + $0x20] sm:$0xff]  }
 0x5d6   :  { %2219 = vmatpush2.bf16.msra.mxu0 %v3195_v54  ;;  %v3217_v54 = vld [vmem:[%s3928_s20 + $0x18] sm:$0xff]  }
 0x5d7   :  { %2220 = vmatprep.subr.bf16.mxu0 %v3200_v55  ;;  %v3218_v55 = vld [vmem:[%s3928_s20 + $0x10] sm:$0xff]  }
 0x5da   :  { %2221 = vmatpush2.bf16.msra.mxu0 %v3198_v56  ;;  %v3219_v56 = vld [vmem:[%s3928_s20 + $0x8] sm:$0xff]   ;;  %s3243_s20 = scalar_lea.vmem %s2506_s15, 32 }
 0x5db   :  { %p3244_p5 = scmp.ne.s32.totalorder %s2506_s15, %s3243_s20  ;;  %p3249_p7 = scmp.lt.s32.totalorder %s3243_s20, %s3243_s20 }
 0x5dd   :  { %p3250_p8 = por %p3249_p7, %p3248_p6 }
 0x5df   :  { %p3251_p9 = pnand %p3250_p8, %p3244_p5 }
 0x61d   :  { %v1852_v6 = vpop.f32.mrf.mxu0  ;;  %v1893_v7 = vpop.f32.mrf.mxu1 }
 0x61e   :  { %v1853_v19 = vadd.f32 %v1852_v6, %v1171_v16 }
 0x61f   :  { %v1854_v8 = vpop.f32.mrf.mxu0  ;;  %v1895_v9 = vpop.f32.mrf.mxu1 }
 0x620   :  { %v1855_v20 = vadd.f32 %v1854_v8, %v1175_v18  ;;  %v1894_v26 = vadd.f32 %v1893_v7, %v1853_v19 }
 0x621   :  { %v1856_v10 = vpop.f32.mrf.mxu0  ;;  %v1897_v11 = vpop.f32.mrf.mxu1 }
 0x622   :  { %v1896_v23 = vadd.f32 %v1895_v9, %v1855_v20 }
 0x623   :  { %v1857_v12 = vpop.f32.mrf.mxu0  ;;  %v1898_v14 = vpop.f32.mrf.mxu1 }
 0x65d   :  { %v1934_v21 = vpop.f32.mrf.mxu0  ;;  %v1975_v22 = vpop.f32.mrf.mxu1 }
 0x65e   :  { %v1935_v24 = vadd.f32 %v1934_v21, %v1894_v26 }
 0x65f   :  { %v1936_v59 = vpop.f32.mrf.mxu0  ;;  %v1977_v60 = vpop.f32.mrf.mxu1 }
 0x660   :  { %v1976_v25 = vadd.f32 %v1975_v22, %v1935_v24  ;;  %v1937_v27 = vadd.f32 %v1936_v59, %v1896_v23 }
 0x661   :  { %v1938_v28 = vpop.f32.mrf.mxu0  ;;  %v1979_v29 = vpop.f32.mrf.mxu1 }
 0x662   :  { %v1978_v30 = vadd.f32 %v1977_v60, %v1937_v27  ;;  %v1982_v31 = vmax.f32 %v1976_v25, 0.0 }
 0x663   :  { %v1939_v32 = vpop.f32.mrf.mxu0  ;;  %v1980_v33 = vpop.f32.mrf.mxu1 }
 0x664   :  { %v1983_v34 = vmax.f32 %v1978_v30, 0.0  ;;  %v1984_v36 = vpack.c.bf16 %v1982_v31, %v1982_v31 }
 0x666   :  { %v1985_v35 = vpack.c.bf16 %v1983_v34, %v1983_v34 }
 0x668   :  { %2222 = vmatprep.mubr.bf16.mxu0 %v1985_v35 }
 0x669   :  { %2223 = vmatmul.mubr.bf16.vlgmr.msra.gmra.mxu0 %v1984_v36 }
 0x729   :  { %v2224_v42 = vpop.f32.mrf.mxu0 }
 0x72a   :  { %v2225_v43 = vadd.f32 %v2224_v42, %v2023_v40 }
 0x72b   :  { %v2226_v44 = vpop.f32.mrf.mxu0 }
 0x72c   :  { %v2227_v45 = vadd.f32 %v2226_v44, %v2027_v41  ;;  %v2231_v51 = vmax.f32 %v2225_v43, 0.0 }
 0x72d   :  { %v2228_v46 = vpop.f32.mrf.mxu0 }
 0x72e   :  { %v2232_v47 = vmax.f32 %v2227_v45, 0.0  ;;  %v2233_v52 = vpack.c.bf16 %v2231_v51, %v2231_v51 }
 0x72f   :  { %v2229_v48 = vpop.f32.mrf.mxu0 }
 0x730   :  { %v2234_v49 = vpack.c.bf16 %v2232_v47, %v2232_v47 }
 0x732   :  { %2776 = vmatprep.mubr.msk.bf16.mxu1 %vm2338_vm6, %v2234_v49 }
 0x733   :  { %2375 = vmatmul.mubr.bf16.vlgmr.msra.gmra.mxu1 %v2233_v52 }
 0x734   :  { %2878 = vmatpush3.bf16.msra.mxu1 %v3213_v50  ;;  %2893 = vmatprep.mubr.msk.bf16.mxu1 %vm3293_vm0, %v3292_v0 }
 0x735   :  { %2879 = vmatprep.subr.bf16.mxu1 %v3292_v0 }
 0x738   :  { %2880 = vmatpush3.bf16.msra.mxu1 %v3214_v15 }
 0x739   :  { %2881 = vmatprep.subr.bf16.mxu1 %v3292_v0 }
 0x73c   :  { %2882 = vmatpush3.bf16.msra.mxu1 %v3215_v17 }
 0x73d   :  { %2883 = vmatprep.subr.bf16.mxu1 %v3292_v0 }
 0x740   :  { %2884 = vmatpush3.bf16.msra.mxu1 %v3216_v53 }
 0x741   :  { %2885 = vmatprep.subr.bf16.mxu1 %v3292_v0 }
 0x744   :  { %2886 = vmatpush3.bf16.msra.mxu1 %v3217_v54 }
 0x745   :  { %2887 = vmatprep.subr.bf16.mxu1 %v3292_v0 }
 0x748   :  { %2888 = vmatpush3.bf16.msra.mxu1 %v3218_v55 }
 0x749   :  { %2889 = vmatprep.subr.bf16.mxu1 %v3292_v0 }
 0x74c   :  { %2890 = vmatpush3.bf16.msra.mxu1 %v3219_v56 }
 0x74d   :  { %2891 = vmatprep.subr.bf16.mxu1 %v3292_v0 }
 0x750   :  { %2892 = vmatpush3.bf16.msra.mxu1 %v3220_v57 }
 0x7f3   :  { %v2376_v61 = vpop.f32.mrf.mxu1 }
 0x7f4   :  { %v2377_v62 = vadd.f32 %v2763_v58, %v2376_v61 }
 0x7f5   :  { %v2378_v63 = vpop.f32.mrf.mxu1 }
 0x7f6   :  { %v2382_v1 = vmax.f32 %v2377_v62, 0.0 }
 0x7f7   :  { %v2379_v2 = vpop.f32.mrf.mxu1 }
 0x7f8   :  { %v2383_v3 = vpack.c.bf16 %v2382_v1, %v2382_v1 }
 0x7f9   :  { %v2380_v4 = vpop.f32.mrf.mxu1 }
 0x7fa   :  { %2894 = vmatmul.mubr.bf16.vlgmr.msra.gmra.mxu1 %v2383_v3 }
 0x7fb   :  { %3254 = shalt.err (!%p3251_p9)
}
 0x7fc   :  { %2508 = dma.vmem_to_hbm [thread:$0]  %s2506_s15, 32, %s3931_s23, [#allocation4]  }
 0x7fd   :  { %s3263_s14 = scalar_lea.vmem %s2516_s30, 32  ;;  %p3268_p11 = scmp.lt.s32.totalorder %s2516_s30, %s2516_s30 }
 0x7fe   :  { %p3264_p10 = scmp.ne.s32.totalorder %s2516_s30, %s3263_s14  ;;  %p3269_p12 = scmp.lt.s32.totalorder %s3263_s14, %s3263_s14 }
 0x800   :  { %p3270_p13 = por %p3269_p12, %p3268_p11 }
 0x802   :  { %p3271_p0 = pnand %p3270_p13, %p3264_p10 }
 0x804   :  { %3274 = shalt.err (!%p3271_p0)
}
 0x805   :  { %2518 = dma.vmem_to_hbm [thread:$0]  %s2516_s30, 32, %s3932_s24, [#allocation7]   ;;  %v2777_v0 = vld [vmem:[%s3929_s21] ss:$0 sm:$0xff]  ;;  %vm2495_vm7 = vcmask 91136  }
 0x8ba   :  { %v2489_v5 = vpop.f32.mrf.mxu1 }
 0x8bb   :  { %v2490_v6 = vadd.f32 %v2777_v0, %v2489_v5 }
 0x8bc   :  { %v2895_v7 = vpop.f32.mrf.mxu1 }
 0x8bd   :  { %2496 = vst.msk [vmem:[%s3930_s22] sm:$0x3] %vm2495_vm7, %v2490_v6 }
 0x8be   :  { %v2492_v8 = vpop.f32.mrf.mxu1 }
 0x8c0   :  { %v2896_v9 = vpop.f32.mrf.mxu1 }
 0x8c1   :  { %3285 = dma.done.wait [#allocation4], 32  }
 0x8c2   :  { %3286 = vsyncadd [#allocation4], 4294967264 }
 0x8c3   :  { %3287 = dma.done.wait [#allocation7], 32  }
 0x8c4   :  { %3288 = vsyncadd [#allocation7], 4294967264 }
 0x8c5   :  { %2527 = vsyncpa [#allocation3], 1 }
 0x8c6   :  { %2528 = vsyncpa [#allocation4], 1 }
 0x8c7   :  { %2529 = vsyncpa [#allocation7], 1 }

</bundles_post_ra>
